<compile_context>
chip_gen: v6e
topology: v6e:2x2x1
jax: 0.10.0
libtpu: 0.0.40
codegen_flags: <defaults>
</compile_context>

<pallas_src>
import functools

import jax
import jax.numpy as jnp
from jax.experimental import pallas as pl
from jax.experimental.pallas import tpu as pltpu

LEAKY_SLOPE = 0.01  # torch.nn.LeakyReLU default negative_slope


def _round_up(x, m):
    return ((x + m - 1) // m) * m


def _nonlinear_kernel(x_ref, w1_ref, b1_ref, w2_ref, b2_ref, o_ref, *, negative_slope):
    # x_ref:  (tm, in_nc)        f32   (in_nc tiny, e.g. 3)
    # w1_ref: (in_nc, ncp)       f32
    # b1_ref: (1, ncp)           f32
    # w2_ref: (ncp, out_pad)     bf16  (out_pad is a multiple of 128)
    # b2_ref: (1, out_pad)       f32
    # o_ref:  (tm, out_pad)      f32
    x = x_ref[...].astype(jnp.float32)
    w1 = w1_ref[...].astype(jnp.float32)
    in_nc = x.shape[1]

    # ---- Layer 1 on the VPU ----------------------------------------------
    # K = in_nc is tiny; a matmul would load only a few of the MXU's weight
    # rows.  Unrolled broadcast FMAs keep the MXU free for layer 2.
    h = b1_ref[...].astype(jnp.float32)          # (1, ncp) -> broadcasts over rows
    for k in range(in_nc):                       # static, fully unrolled
        h = h + x[:, k:k + 1] * w1[k:k + 1, :]   # (tm,1)*(1,ncp) outer-product FMA

    # LeakyReLU (VPU elementwise)
    h = jnp.where(h >= 0, h, negative_slope * h)

    # ---- Layer 2 on the MXU (bf16 in, f32 accumulate, lane-dense N) --------
    o = jnp.dot(h.astype(jnp.bfloat16), w2_ref[...],
                preferred_element_type=jnp.float32)
    o_ref[...] = (o + b2_ref[...]).astype(o_ref.dtype)


@functools.partial(jax.jit, static_argnames=("tm", "negative_slope"))
def nonlinear_forward(x, w1, b1, w2, b2, *, tm=256, negative_slope=LEAKY_SLOPE):
    """NonLinear forward: LeakyReLU(x @ W1^T + b1) @ W2^T + b2.

    x:  [M, in_nc]
    w1: [nc, in_nc]        (torch nn.Linear layout [out, in])
    b1: [nc]
    w2: [out_dim, nc]      out_dim = out_nc * num_sheets
    b2: [out_dim]
    """
    M, in_nc = x.shape
    nc = w1.shape[0]
    out_dim = w2.shape[0]

    tm = max(8, _round_up(tm, 8))
    Mp = _round_up(M, tm)                 # pad rows so the grid divides evenly
    ncp = _round_up(nc, 128)              # lane-aligned hidden width
    out_pad = _round_up(out_dim, 128)     # lane-dense output store

    # Glue: pad / transpose / cast once outside the kernel (all zero-padding is
    # mathematically exact for this network).
    x_p = jnp.pad(x.astype(jnp.float32), ((0, Mp - M), (0, 0)))
    w1_t = jnp.pad(w1.T.astype(jnp.float32), ((0, 0), (0, ncp - nc)))            # (in_nc, ncp)
    b1_p = jnp.pad(b1.astype(jnp.float32), (0, ncp - nc)).reshape(1, ncp)
    w2_t = jnp.pad(w2.T.astype(jnp.bfloat16), ((0, ncp - nc), (0, out_pad - out_dim)))  # (ncp, out_pad)
    b2_p = jnp.pad(b2.astype(jnp.float32), (0, out_pad - out_dim)).reshape(1, out_pad)

    grid = (Mp // tm,)
    kernel = functools.partial(_nonlinear_kernel, negative_slope=negative_slope)

    out_p = pl.pallas_call(
        kernel,
        out_shape=jax.ShapeDtypeStruct((Mp, out_pad), jnp.float32),
        grid_spec=pltpu.PrefetchScalarGridSpec(
            num_scalar_prefetch=0,
            grid=grid,
            in_specs=[
                pl.BlockSpec((tm, in_nc), lambda i: (i, 0)),        # x tile
                pl.BlockSpec((in_nc, ncp), lambda i: (0, 0)),       # W1^T (full, resident)
                pl.BlockSpec((1, ncp), lambda i: (0, 0)),           # b1
                pl.BlockSpec((ncp, out_pad), lambda i: (0, 0)),     # W2^T (full, bf16)
                pl.BlockSpec((1, out_pad), lambda i: (0, 0)),       # b2
            ],
            out_specs=pl.BlockSpec((tm, out_pad), lambda i: (i, 0)),
        ),
        compiler_params=pltpu.CompilerParams(
            dimension_semantics=("parallel",),
        ),
    )(x_p, w1_t, b1_p, w2_t, b2_p)

    return out_p[:M, :out_dim].astype(x.dtype)


if __name__ == "__main__":
    # Small shapes consistent with NonLinear(in_nc=3, nc=..., out_nc=1, num_sheets=4).
    in_nc = 3
    nc = 512           # hidden width (module default is 1600; kept small & 128-aligned)
    out_nc = 1
    num_sheets = 4
    out_dim = out_nc * num_sheets
    batch = 512        # with tm=256 -> grid=(2,), so both v7x TensorCores get work

    key = jax.random.PRNGKey(0)
    k_x, k_w1, k_b1, k_w2, k_b2 = jax.random.split(key, 5)

    # nn.Linear-style uniform init (bound = 1/sqrt(fan_in)), torch [out, in] layout.
    bound1 = 1.0 / (in_nc ** 0.5)
    bound2 = 1.0 / (nc ** 0.5)
    w1 = jax.random.uniform(k_w1, (nc, in_nc), jnp.float32, -bound1, bound1)
    b1 = jax.random.uniform(k_b1, (nc,), jnp.float32, -bound1, bound1)
    w2 = jax.random.uniform(k_w2, (out_dim, nc), jnp.float32, -bound2, bound2)
    b2 = jax.random.uniform(k_b2, (out_dim,), jnp.float32, -bound2, bound2)

    x = jax.random.normal(k_x, (batch, in_nc), jnp.float32)

    out = nonlinear_forward(x, w1, b1, w2, b2, tm=256)
    out = jax.block_until_ready(out)

    # Pure-JAX f32 reference.
    h_ref = x @ w1.T + b1
    h_ref = jnp.where(h_ref >= 0, h_ref, LEAKY_SLOPE * h_ref)
    out_ref = h_ref @ w2.T + b2

    assert out.shape == (batch, out_dim)
    # Layer 2 uses bf16 MXU inputs with f32 accumulation -> loosened tolerance.
    assert jnp.allclose(out, out_ref, rtol=2e-2, atol=2e-2), float(
        jnp.max(jnp.abs(out - out_ref)))

    print("KERNEL_OK")
</pallas_src>

<mosaic_0001>
module attributes {stable_mosaic.version = 11 : i64} {
  func.func @_nonlinear_kernel(%arg0: i32, %arg1: memref<256x3xf32, #tpu.memory_space<vmem>>, %arg2: memref<3x512xf32, #tpu.memory_space<vmem>>, %arg3: memref<1x512xf32, #tpu.memory_space<vmem>>, %arg4: memref<512x128xbf16, #tpu.memory_space<vmem>>, %arg5: memref<1x128xf32, #tpu.memory_space<vmem>>, %arg6: memref<256x128xf32, #tpu.memory_space<vmem>>) attributes {dimension_semantics = [#tpu.dimension_semantics<parallel>], iteration_bounds = array<i64: 2>, scalar_prefetch = 0 : i64, scratch_operands = 0 : i64, tpu.core_type = #tpu.core_type<tc>, window_params = [{transform_indices = @transform_0, window_bounds = array<i64: 256, 3>}, {pipeline_mode = #tpu.pipeline_mode<synchronous>, transform_indices = @transform_1, window_bounds = array<i64: 3, 512>}, {pipeline_mode = #tpu.pipeline_mode<synchronous>, transform_indices = @transform_2, window_bounds = array<i64: 1, 512>}, {pipeline_mode = #tpu.pipeline_mode<synchronous>, transform_indices = @transform_3, window_bounds = array<i64: 512, 128>}, {pipeline_mode = #tpu.pipeline_mode<synchronous>, transform_indices = @transform_4, window_bounds = array<i64: 1, 128>}, {transform_indices = @transform_5, window_bounds = array<i64: 256, 128>}]} {
    %c0 = arith.constant 0 : index
    %c0_0 = arith.constant 0 : index
    %0 = vector.load %arg1[%c0, %c0_0] : memref<256x3xf32, #tpu.memory_space<vmem>>, vector<256x3xf32>
    %c0_1 = arith.constant 0 : index
    %c0_2 = arith.constant 0 : index
    %1 = vector.load %arg2[%c0_1, %c0_2] : memref<3x512xf32, #tpu.memory_space<vmem>>, vector<3x512xf32>
    %c0_3 = arith.constant 0 : index
    %c0_4 = arith.constant 0 : index
    %2 = vector.load %arg3[%c0_3, %c0_4] : memref<1x512xf32, #tpu.memory_space<vmem>>, vector<1x512xf32>
    %3 = vector.extract_strided_slice %0 {offsets = [0, 0], sizes = [256, 1], strides = [1, 1]} : vector<256x3xf32> to vector<256x1xf32>
    %4 = vector.extract_strided_slice %1 {offsets = [0, 0], sizes = [1, 512], strides = [1, 1]} : vector<3x512xf32> to vector<1x512xf32>
    %5 = vector.broadcast %3 : vector<256x1xf32> to vector<256x512xf32>
    %6 = vector.broadcast %4 : vector<1x512xf32> to vector<256x512xf32>
    %7 = arith.mulf %5, %6 : vector<256x512xf32>
    %8 = vector.broadcast %2 : vector<1x512xf32> to vector<256x512xf32>
    %9 = arith.addf %8, %7 : vector<256x512xf32>
    %10 = vector.extract_strided_slice %0 {offsets = [0, 1], sizes = [256, 1], strides = [1, 1]} : vector<256x3xf32> to vector<256x1xf32>
    %11 = vector.extract_strided_slice %1 {offsets = [1, 0], sizes = [1, 512], strides = [1, 1]} : vector<3x512xf32> to vector<1x512xf32>
    %12 = vector.broadcast %10 : vector<256x1xf32> to vector<256x512xf32>
    %13 = vector.broadcast %11 : vector<1x512xf32> to vector<256x512xf32>
    %14 = arith.mulf %12, %13 : vector<256x512xf32>
    %15 = arith.addf %9, %14 : vector<256x512xf32>
    %16 = vector.extract_strided_slice %0 {offsets = [0, 2], sizes = [256, 1], strides = [1, 1]} : vector<256x3xf32> to vector<256x1xf32>
    %17 = vector.extract_strided_slice %1 {offsets = [2, 0], sizes = [1, 512], strides = [1, 1]} : vector<3x512xf32> to vector<1x512xf32>
    %18 = vector.broadcast %16 : vector<256x1xf32> to vector<256x512xf32>
    %19 = vector.broadcast %17 : vector<1x512xf32> to vector<256x512xf32>
    %20 = arith.mulf %18, %19 : vector<256x512xf32>
    %21 = arith.addf %15, %20 : vector<256x512xf32>
    %cst = arith.constant 0.000000e+00 : f32
    %22 = vector.broadcast %cst : f32 to vector<256x512xf32>
    %23 = arith.cmpf oge, %21, %22 : vector<256x512xf32>
    %cst_5 = arith.constant 0.00999999977 : f32
    %24 = vector.broadcast %cst_5 : f32 to vector<256x512xf32>
    %25 = arith.mulf %24, %21 : vector<256x512xf32>
    %26 = arith.select %23, %21, %25 : vector<256x512xi1>, vector<256x512xf32>
    %27 = arith.truncf %26 : vector<256x512xf32> to vector<256x512xbf16>
    %c0_6 = arith.constant 0 : index
    %c0_7 = arith.constant 0 : index
    %28 = vector.load %arg4[%c0_6, %c0_7] : memref<512x128xbf16, #tpu.memory_space<vmem>>, vector<512x128xbf16>
    %cst_8 = arith.constant dense<0.000000e+00> : vector<256x128xf32>
    %29 = tpu.matmul %27, %28, %cst_8 {dimension_numbers = #tpu.dot_dimension_numbers<[1], [0], [0], [1], [0, 0, 1, 1], [], []>} : vector<256x512xbf16>, vector<512x128xbf16>, vector<256x128xf32> -> vector<256x128xf32>
    %c0_9 = arith.constant 0 : index
    %c0_10 = arith.constant 0 : index
    %30 = vector.load %arg5[%c0_9, %c0_10] : memref<1x128xf32, #tpu.memory_space<vmem>>, vector<1x128xf32>
    %31 = vector.broadcast %30 : vector<1x128xf32> to vector<256x128xf32>
    %32 = arith.addf %29, %31 : vector<256x128xf32>
    %c0_11 = arith.constant 0 : index
    %c0_12 = arith.constant 0 : index
    %33 = vector.load %arg6[%c0_11, %c0_12] : memref<256x128xf32, #tpu.memory_space<vmem>>, vector<256x128xf32>
    tpu.vector_store %arg6[%c0_11, %c0_12], %32 {strides = array<i32>} : memref<256x128xf32, #tpu.memory_space<vmem>>, vector<256x128xf32>,
    return
  }
  func.func @transform_0(%arg0: i32) -> (i32, i32) {
    %c0_i32 = arith.constant 0 : i32
    %c0_i32_0 = arith.constant 0 : i32
    return %arg0, %c0_i32 : i32, i32
  }
  func.func @transform_1(%arg0: i32) -> (i32, i32) {
    %c0_i32 = arith.constant 0 : i32
    %c0_i32_0 = arith.constant 0 : i32
    %c0_i32_1 = arith.constant 0 : i32
    return %c0_i32, %c0_i32_0 : i32, i32
  }
  func.func @transform_2(%arg0: i32) -> (i32, i32) {
    %c0_i32 = arith.constant 0 : i32
    %c0_i32_0 = arith.constant 0 : i32
    %c0_i32_1 = arith.constant 0 : i32
    return %c0_i32, %c0_i32_0 : i32, i32
  }
  func.func @transform_3(%arg0: i32) -> (i32, i32) {
    %c0_i32 = arith.constant 0 : i32
    %c0_i32_0 = arith.constant 0 : i32
    %c0_i32_1 = arith.constant 0 : i32
    return %c0_i32, %c0_i32_0 : i32, i32
  }
  func.func @transform_4(%arg0: i32) -> (i32, i32) {
    %c0_i32 = arith.constant 0 : i32
    %c0_i32_0 = arith.constant 0 : i32
    %c0_i32_1 = arith.constant 0 : i32
    return %c0_i32, %c0_i32_0 : i32, i32
  }
  func.func @transform_5(%arg0: i32) -> (i32, i32) {
    %c0_i32 = arith.constant 0 : i32
    %c0_i32_0 = arith.constant 0 : i32
    return %arg0, %c0_i32 : i32, i32
  }
}

</mosaic_0001>

<bundles_post_ra>
// kernel: nonlinear_forward.1
= control target key start
LH: loop header
LB: loop body
LE: loop exit
PB: predicated region body
PF: predicated region fallthrough
CT: control target
= control target key end

     0   :  { %s3116_s18 = smov 0   ;;  %s4561_s0 = inlined_call_operand.vmem [shape: f32[512,3], index: 0, kind: input, shape index: {}]   ;;  %s4562_s1 = inlined_call_operand.vmem [shape: f32[3,512], index: 1, kind: input, shape index: {}]   ;;  %s4563_s2 = inlined_call_operand.vmem [shape: f32[1,512], index: 2, kind: input, shape index: {}]   ;;  %s4564_s3 = inlined_call_operand.vmem [shape: bf16[512,128], index: 3, kind: input, shape index: {}]   ;;  %s4565_s4 = inlined_call_operand.vmem [shape: f32[1,128], index: 4, kind: input, shape index: {}]   ;;  %s4566_s5 = inlined_call_operand.vmem [shape: f32[512,128], index: 5, kind: output, shape index: {}]  }
   0x1 LB: > { %s2700_s19 = sadd.s32 4294967295, %s3081_s18   ;;  %p2704_p0 = scmp.ge.s32.totalorder %s3081_s18, 1  ;;  %s3081_s18 = sphi %s3116_s18, %s15_s18  }
   0x2   : > { %p188_p1 = scmp.lt.s32.totalorder %s3081_s18, 3 }
   0x4   : > { %p189_p2 = pnand %p2704_p0, %p188_p1 }
   0x6   : > { %192 = sbr.rel (%p189_p2) target bundleno = 672 (0x2a0), region = 40 }
   0xb   : > { %s2705_s20 = sshll.u32 %s2700_s19, 5  ;;  %v4571_v0 = vmov 2   ;;  %v4567_v1 = vmov 1   ;;  %v3033_v2 = vld [vmem:[%s4564_s3 + $0x78] sm:$0xff]   ;;  %v3037_v6 = vld [vmem:[%s4564_s3 + $0x70] sm:$0xff]   ;;  %v3041_v14 = vld [vmem:[%s4564_s3 + $0x68] sm:$0xff]   ;;  %v426_v61 = vlaneseq }
   0xc   : > { %2980 = vset.pattern.permute.xlu0 %v4571_v0  ;;  %2979 = vset.pattern.permute.xlu1 %v4567_v1  ;;  %p217_p3 = scmp.lt.s32.totalorder %s2705_s20, 63  ;;  %v3034_v3 = vld [vmem:[%s4564_s3 + $0xf8] sm:$0xff]   ;;  %v3038_v11 = vld [vmem:[%s4564_s3 + $0xf0] sm:$0xff]   ;;  %v3042_v15 = vld [vmem:[%s4564_s3 + $0xe8] sm:$0xff]   ;;  %v4569_v18 = vmov 0  }
   0xd   : > { %2744 = vmatprep.subr.bf16.mxu0 %v3033_v2  ;;  %v3035_v4 = vld [vmem:[%s4564_s3 + $0x38] sm:$0xff]   ;;  %2856 = vmatprep.subr.bf16.mxu1 %v3034_v3  ;;  %v3039_v12 = vld [vmem:[%s4564_s3 + $0x30] sm:$0xff]   ;;  %v3043_v16 = vld [vmem:[%s4564_s3 + $0x28] sm:$0xff]   ;;  %v427_v63 = vshrl.u32 %v426_v61, 7 }
   0xe   : > { %s4621_s20 = smov (!%p217_p3, %s2705_s20), 63  ;;  %2745 = vmatpush3.bf16.msra.mxu0 %v3035_v4  ;;  %v3036_v5 = vld [vmem:[%s4564_s3 + $0xb8] sm:$0xff]   ;;  %v3040_v13 = vld [vmem:[%s4564_s3 + $0xb0] sm:$0xff]   ;;  %v3044_v17 = vld [vmem:[%s4564_s3 + $0xa8] sm:$0xff]  }
   0xf   : > { %s2706_s27 = sshll.u32 %s4621_s20, 3  ;;  %2857 = vmatpush3.bf16.msra.mxu1 %v3036_v5  ;;  %2746 = vmatprep.subr.bf16.mxu0 %v3037_v6  ;;  %v3045_v19 = vld [vmem:[%s4564_s3 + $0x60] sm:$0xff]   ;;  %v3049_v24 = vld [vmem:[%s4564_s3 + $0x58] sm:$0xff]   ;;  %v3053_v29 = vld [vmem:[%s4564_s3 + $0x50] sm:$0xff]   ;;  %v597_v2 = vsub.s32 1, %v427_v63  ;;  %v873_v3 = vsub.s32 5, %v427_v63 }
  0x10   : > { %s3146_s7 = scalar_lea.vmem %s4561_s0, %s2706_s27  ;;  %2858 = vmatprep.subr.bf16.mxu1 %v3038_v11  ;;  %v3046_v20 = vld [vmem:[%s4564_s3 + $0xe0] sm:$0xff]   ;;  %v3050_v25 = vld [vmem:[%s4564_s3 + $0xd8] sm:$0xff]   ;;  %v3054_v30 = vld [vmem:[%s4564_s3 + $0xd0] sm:$0xff]   ;;  %v601_v6 = vsub.s32 2, %v427_v63  ;;  %s4257_s10 = scalar_lea.vmem %s4566_s5, %s2706_s27 }
  0x11   : > { %v229_v7 = vld [vmem:[%s3146_s7] sm:$0xff]  ;;  %v231_v8 = vld [vmem:[%s3146_s7 + $0x10] sm:$0xff]  ;;  %v230_v9 = vld [vmem:[%s3146_s7 + $0x8] sm:$0xff] }
  0x12   : > { %1160 = vperm.xlu0 %2980, %v229_v7   ;;  %740 = vperm.xlu1 %2979, %v229_v7   ;;  %v3155_v10 = vld [vmem:[%s3146_s7 + $0x20] sm:$0xff]  ;;  %v232_v23 = vld [vmem:[%s3146_s7 + $0x18] sm:$0xff]  ;;  %v234_v28 = vld [vmem:[%s3146_s7 + $0x28] sm:$0xff] }
  0x13   : > { %2747 = vmatpush3.bf16.msra.mxu0 %v3039_v12  ;;  %2859 = vmatpush3.bf16.msra.mxu1 %v3040_v13  ;;  %v3047_v21 = vld [vmem:[%s4564_s3 + $0x20] sm:$0xff]   ;;  %v3051_v26 = vld [vmem:[%s4564_s3 + $0x18] sm:$0xff]   ;;  %v3055_v31 = vld [vmem:[%s4564_s3 + $0x10] sm:$0xff]  }
  0x14   : > { %2748 = vmatprep.subr.bf16.mxu0 %v3041_v14  ;;  %2860 = vmatprep.subr.bf16.mxu1 %v3042_v15  ;;  %v3048_v22 = vld [vmem:[%s4564_s3 + $0xa0] sm:$0xff]   ;;  %v3052_v27 = vld [vmem:[%s4564_s3 + $0x98] sm:$0xff]   ;;  %v3056_v32 = vld [vmem:[%s4564_s3 + $0x90] sm:$0xff]  }
  0x15   : > { %v236_v33 = vld [vmem:[%s3146_s7 + $0x38] sm:$0xff]  ;;  %v3057_v34 = vld [vmem:[%s4564_s3 + $0x48] sm:$0xff]   ;;  %v3061_v39 = vld [vmem:[%s4564_s3 + $0x40] sm:$0xff]  }
  0x16   : > { %1168 = vperm.xlu0 %2980, %v231_v8   ;;  %744 = vperm.xlu1 %2979, %v230_v9   ;;  %v3058_v35 = vld [vmem:[%s4564_s3 + $0xc8] sm:$0xff]   ;;  %v3062_v40 = vld [vmem:[%s4564_s3 + $0xc0] sm:$0xff]   ;;  %v240_v43 = vld [vmem:[%s3146_s7 + $0x58] sm:$0xff] }
  0x17   : > { %2749 = vmatpush3.bf16.msra.mxu0 %v3043_v16  ;;  %2861 = vmatpush3.bf16.msra.mxu1 %v3044_v17  ;;  %v3059_v36 = vld [vmem:[%s4564_s3 + $0x8] sm:$0xff]   ;;  %v3063_v41 = vld [vmem:[%s4564_s3] sm:$0xff]   ;;  %v3258_v45 = vld [vmem:[%s3146_s7 + $0x78] sm:$0xff] }
  0x18   : > { %2750 = vmatprep.subr.bf16.mxu0 %v3045_v19  ;;  %2862 = vmatprep.subr.bf16.mxu1 %v3046_v20  ;;  %v238_v37 = vld [vmem:[%s3146_s7 + $0x48] sm:$0xff]  ;;  %v3064_v42 = vld [vmem:[%s4564_s3 + $0x80] sm:$0xff]   ;;  %v235_v46 = vld [vmem:[%s3146_s7 + $0x30] sm:$0xff] }
  0x19   : > { %v3060_v38 = vld [vmem:[%s4564_s3 + $0x88] sm:$0xff]   ;;  %v237_v47 = vld [vmem:[%s3146_s7 + $0x40] sm:$0xff]  ;;  %v239_v48 = vld [vmem:[%s3146_s7 + $0x50] sm:$0xff] }
  0x1a   : > { %1176 = vperm.xlu0 %2980, %v3155_v10   ;;  %2981 = vset.pattern.permute.xlu1 %v4571_v0  ;;  %v3254_v44 = vld [vmem:[%s3146_s7 + $0x68] sm:$0xff]  ;;  %v241_v49 = vld [vmem:[%s3146_s7 + $0x60] sm:$0xff]  ;;  %v3271_v50 = vld [vmem:[%s3146_s7 + $0x70] sm:$0xff] }
  0x1b   : > { %1164 = vperm.xlu1 %2981, %v230_v9   ;;  %2751 = vmatpush3.bf16.msra.mxu0 %v3047_v21  ;;  %v3275_v51 = vld [vmem:[%s3146_s7 + $0x80] sm:$0xff]  ;;  %v3280_v52 = vld [vmem:[%s3146_s7 + $0x90] sm:$0xff]  ;;  %v3289_v54 = vld [vmem:[%s3146_s7 + $0x88] sm:$0xff] }
  0x1c   : > { %2863 = vmatpush3.bf16.msra.mxu1 %v3048_v22  ;;  %2752 = vmatprep.subr.bf16.mxu0 %v3049_v24  ;;  %v3285_v53 = vld [vmem:[%s3146_s7 + $0xa0] sm:$0xff]  ;;  %v3295_v55 = vld [vmem:[%s3146_s7 + $0x98] sm:$0xff]  ;;  %v3299_v56 = vld [vmem:[%s3146_s7 + $0xa8] sm:$0xff] }
  0x1d   : > { %2864 = vmatprep.subr.bf16.mxu1 %v3050_v25  ;;  %4581 = vst [vmem:[#allocation2_spill] sm:$0xff] %v3285_v53  ;;  %4582 = vst [vmem:[#allocation3_spill] sm:$0xff] %v3295_v55  ;;  %v252_v57 = vld [vmem:[%s3146_s7 + $0xb8] sm:$0xff]  ;;  %v254_v58 = vld [vmem:[%s3146_s7 + $0xc8] sm:$0xff]  ;;  %v605_v25 = vsub.s32 3, %v427_v63 }
  0x1e   : > { %2987 = vset.pattern.permute.xlu0 %v4569_v18  ;;  %4583 = vst [vmem:[#allocation4_spill] sm:$0xff] %v3299_v56  ;;  %v256_v59 = vld [vmem:[%s3146_s7 + $0xd8] sm:$0xff]  ;;  %v3309_v60 = vld [vmem:[%s3146_s7 + $0xb0] sm:$0xff]  ;;  %v253_v62 = vld [vmem:[%s3146_s7 + $0xc0] sm:$0xff] }
  0x1f   : > { %266 = vperm.xlu0 %2987, %v229_v7   ;;  %2982 = vset.pattern.permute.xlu1 %v4569_v18  ;;  %4584 = vst [vmem:[#allocation5_spill] sm:$0xff] %v3309_v60  ;;  %v261_v4 = vld [vmem:[%s4562_s1] sm:$0x77]  ;;  %v262_v5 = vld [vmem:[%s4562_s1 + $0x8] sm:$0x77]  ;;  %v1293_v7 = vsub.s32 6, %v427_v63 }
  0x20   : > { %276 = vperm.xlu1 %2982, %v231_v8   ;;  %2753 = vmatpush3.bf16.msra.mxu0 %v3051_v26  ;;  %v874_v11 = vrot.slane %v261_v4, %v873_v3  ;;  %v878_v12 = vrot.slane %v262_v5, %v597_v2  ;;  %v882_v13 = vrot.slane %v262_v5, %v873_v3 }
  0x21   : > { %2865 = vmatpush3.bf16.msra.mxu1 %v3052_v27  ;;  %2754 = vmatprep.subr.bf16.mxu0 %v3053_v29  ;;  %v1290_v16 = vrot.slane %v261_v4, %v601_v6  ;;  %v1294_v17 = vrot.slane %v261_v4, %v1293_v7  ;;  %v1298_v19 = vrot.slane %v262_v5, %v601_v6 }
  0x22   : > { %2866 = vmatprep.subr.bf16.mxu1 %v3054_v30  ;;  %v1302_v20 = vrot.slane %v262_v5, %v1293_v7  ;;  %v3327_v27 = vrot.slane %v874_v11, %v597_v2  ;;  %v3331_v29 = vrot.slane %v882_v13, %v597_v2 }
  0x23   : > { %271 = vperm.xlu0 %2987, %v230_v9   ;;  %v432_v9 = vsub.s32 4, %v427_v63 }
  0x24   : > { %2983 = vset.pattern.permute.xlu1 %v4567_v1  ;;  %2755 = vmatpush3.bf16.msra.mxu0 %v3055_v31 }
  0x25   : > { %748 = vperm.xlu1 %2983, %v231_v8   ;;  %2867 = vmatpush3.bf16.msra.mxu1 %v3056_v32  ;;  %v428_v8 = vsub.s32 0, %v427_v63  ;;  %v433_v22 = vrot.slane %v261_v4, %v432_v9  ;;  %v441_v24 = vrot.slane %v262_v5, %v432_v9  ;;  %v263_v32 = vld [vmem:[%s4563_s2] sm:$0xf] }
  0x26   : > { %2756 = vmatprep.subr.bf16.mxu0 %v3057_v34  ;;  %2868 = vmatprep.subr.bf16.mxu1 %v3058_v35  ;;  %v3339_v34 = vrot.slane %v1294_v17, %v601_v6  ;;  %v3341_v35 = vrot.slane %v1298_v19, %v601_v6 }
  0x27   : > { %281 = vperm.xlu0 %2987, %v232_v23   ;;  %v429_v21 = vrot.slane %v261_v4, %v428_v8 }
  0x28   : > { %2757 = vmatpush3.bf16.msra.mxu0 %v3059_v36  ;;  %v3343_v36 = vrot.slane %v1302_v20, %v601_v6 }
  0x29   : > { %752 = vperm.xlu1 %2983, %v232_v23   ;;  %2869 = vmatpush3.bf16.msra.mxu1 %v3060_v38  ;;  %v3348_v38 = vrot.slane %v433_v22, %v428_v8 }
  0x2a   : > { %2758 = vmatprep.subr.bf16.mxu0 %v3061_v39  ;;  %2870 = vmatprep.subr.bf16.mxu1 %v3062_v40  ;;  %v3352_v40 = vrot.slane %v441_v24, %v428_v8 }
  0x2b   : > { %291 = vperm.xlu0 %2987, %v234_v28  }
  0x2c   : > { %2759 = vmatpush3.bf16.msra.mxu0 %v3063_v41  ;;  %v255_v41 = vld [vmem:[%s3146_s7 + $0xd0] sm:$0xff] }
  0x2d   : > { %2984 = vset.pattern.permute.xlu1 %v4571_v0  ;;  %2871 = vmatpush3.bf16.msra.mxu1 %v3064_v42  ;;  %v3355_v42 = vrot.slane %v263_v32, %v428_v8 }
  0x2e   : > { %1172 = vperm.xlu1 %2984, %v232_v23   ;;  %v437_v23 = vrot.slane %v262_v5, %v428_v8 }
  0x2f   : > { %301 = vperm.xlu0 %2987, %v236_v33  }
  0x30   : > { %v3350_v39 = vrot.slane %v437_v23, %v428_v8 }
  0x32   : > { %2985 = vset.pattern.permute.xlu1 %v4569_v18 }
  0x33   : > { %286 = vperm.xlu1 %2985, %v3155_v10   ;;  %311 = vperm.xlu0 %2987, %v238_v37  }
  0x37   : > { %2986 = vset.pattern.permute.xlu1 %v4567_v1  ;;  %321 = vperm.xlu0 %2987, %v240_v43  }
  0x38   : > { %756 = vperm.xlu1 %2986, %v3155_v10   ;;  %v870_v10 = vrot.slane %v261_v4, %v597_v2 }
  0x3a   : > { %v3325_v26 = vrot.slane %v870_v10, %v597_v2 }
  0x3b   : > { %331 = vperm.xlu0 %2987, %v3254_v44  }
  0x3c   : > { %760 = vperm.xlu1 %2986, %v234_v28  }
  0x3f   : > { %341 = vperm.xlu0 %2987, %v3258_v45  }
  0x40   : > { %2988 = vset.pattern.permute.xlu1 %v4571_v0 }
  0x41   : > { %1180 = vperm.xlu1 %2988, %v234_v28   ;;  %v3329_v28 = vrot.slane %v878_v12, %v597_v2 }
  0x43   : > { %3002 = vset.pattern.permute.xlu0 %v4571_v0 }
  0x44   : > { %1184 = vperm.xlu0 %3002, %v235_v46  }
  0x45   : > { %2989 = vset.pattern.permute.xlu1 %v4569_v18 }
  0x46   : > { %296 = vperm.xlu1 %2989, %v235_v46  }
  0x48   : > { %1192 = vperm.xlu0 %3002, %v237_v47  }
  0x4a   : > { %2990 = vset.pattern.permute.xlu1 %v4567_v1 }
  0x4b   : > { %764 = vperm.xlu1 %2990, %v235_v46   ;;  %v3361_v46 = vrot.slane %v263_v32, %v605_v25 }
  0x4c   : > { %1200 = vperm.xlu0 %3002, %v239_v48  }
  0x4f   : > { %768 = vperm.xlu1 %2990, %v236_v33  }
  0x50   : > { %1208 = vperm.xlu0 %3002, %v241_v49  }
  0x53   : > { %2991 = vset.pattern.permute.xlu1 %v4571_v0 }
  0x54   : > { %1188 = vperm.xlu1 %2991, %v236_v33   ;;  %1216 = vperm.xlu0 %3002, %v3271_v50   ;;  %v3337_v33 = vrot.slane %v1290_v16, %v601_v6 }
  0x58   : > { %2992 = vset.pattern.permute.xlu1 %v4569_v18  ;;  %1224 = vperm.xlu0 %3002, %v3275_v51  }
  0x59   : > { %306 = vperm.xlu1 %2992, %v237_v47  }
  0x5c   : > { %1232 = vperm.xlu0 %3002, %v3280_v52  }
  0x5d   : > { %2993 = vset.pattern.permute.xlu1 %v4567_v1 }
  0x5e   : > { %772 = vperm.xlu1 %2993, %v237_v47  }
  0x60   : > { %1240 = vperm.xlu0 %3002, %v3285_v53  }
  0x62   : > { %776 = vperm.xlu1 %2993, %v238_v37  }
  0x64   : > { %3013 = vset.pattern.permute.xlu0 %v4569_v18 }
  0x65   : > { %351 = vperm.xlu0 %3013, %v3289_v54  }
  0x66   : > { %2994 = vset.pattern.permute.xlu1 %v4571_v0 }
  0x67   : > { %1196 = vperm.xlu1 %2994, %v238_v37   ;;  %v3346_v37 = vrot.slane %v429_v21, %v428_v8 }
  0x69   : > { %361 = vperm.xlu0 %3013, %v3295_v55  }
  0x6b   : > { %2995 = vset.pattern.permute.xlu1 %v4569_v18 }
  0x6c   : > { %316 = vperm.xlu1 %2995, %v239_v48  }
  0x6d   : > { %371 = vperm.xlu0 %3013, %v3299_v56  }
  0x70   : > { %2996 = vset.pattern.permute.xlu1 %v4567_v1 }
  0x71   : > { %780 = vperm.xlu1 %2996, %v239_v48   ;;  %381 = vperm.xlu0 %3013, %v252_v57  }
  0x75   : > { %784 = vperm.xlu1 %2996, %v240_v43   ;;  %391 = vperm.xlu0 %3013, %v254_v58  }
  0x79   : > { %2997 = vset.pattern.permute.xlu1 %v4571_v0  ;;  %401 = vperm.xlu0 %3013, %v256_v59  }
  0x7a   : > { %1204 = vperm.xlu1 %2997, %v240_v43   ;;  %v3357_v43 = vrot.slane %v263_v32, %v597_v2 }
  0x7d   : > { %3022 = vset.pattern.permute.xlu0 %v4571_v0 }
  0x7e   : > { %2998 = vset.pattern.permute.xlu1 %v4569_v18  ;;  %1248 = vperm.xlu0 %3022, %v3309_v60  }
  0x7f   : > { %326 = vperm.xlu1 %2998, %v241_v49  }
  0x82   : > { %1256 = vperm.xlu0 %3022, %v253_v62  }
  0x83   : > { %2999 = vset.pattern.permute.xlu1 %v4567_v1 }
  0x84   : > { %788 = vperm.xlu1 %2999, %v241_v49  }
  0x86   : > { %1264 = vperm.xlu0 %3022, %v255_v41  }
  0x88   : > { %792 = vperm.xlu1 %2999, %v3254_v44  }
  0x8c   : > { %3000 = vset.pattern.permute.xlu1 %v4571_v0 }
  0x8d   : > { %1212 = vperm.xlu1 %3000, %v3254_v44   ;;  %v741_v14 = vpop.permute.xlu1 %740  ;;  %v1161_v15 = vpop.permute.xlu0 %1160  ;;  %v3359_v44 = vrot.slane %v263_v32, %v601_v6 }
  0x8e   : > { %v903_v47 = vmul.f32 %v3325_v26, %v741_v14  ;;  %v904_v48 = vmul.f32 %v3327_v27, %v741_v14  ;;  %v905_v49 = vmul.f32 %v3329_v28, %v741_v14  ;;  %v906_v57 = vmul.f32 %v3331_v29, %v741_v14 }
  0x8f   : > { %v3368_v59 = vmul.f32 %v3337_v33, %v1161_v15  ;;  %v3371_v61 = vmul.f32 %v3339_v34, %v1161_v15  ;;  %v3374_v62 = vmul.f32 %v3341_v35, %v1161_v15  ;;  %v3377_v63 = vmul.f32 %v3343_v36, %v1161_v15 }
  0x91   : > { %3001 = vset.pattern.permute.xlu1 %v4569_v18  ;;  %v745_v30 = vpop.permute.xlu1 %744  ;;  %v1169_v31 = vpop.permute.xlu0 %1168 }
  0x92   : > { %336 = vperm.xlu1 %3001, %v3271_v50   ;;  %v907_v3 = vmul.f32 %v3325_v26, %v745_v30  ;;  %v3382_v4 = vmul.f32 %v3327_v27, %v745_v30  ;;  %v909_v5 = vmul.f32 %v3329_v28, %v745_v30  ;;  %v3386_v6 = vmul.f32 %v3331_v29, %v745_v30 }
  0x93   : > { %v3390_v7 = vmul.f32 %v3337_v33, %v1169_v31  ;;  %v3393_v8 = vmul.f32 %v3339_v34, %v1169_v31  ;;  %v3396_v9 = vmul.f32 %v3341_v35, %v1169_v31  ;;  %v3399_v10 = vmul.f32 %v3343_v36, %v1169_v31 }
  0x95   : > { %v1177_v58 = vpop.permute.xlu0 %1176  ;;  %4585 = vst [vmem:[#allocation6_spill] sm:$0xff] %v3396_v9 }
  0x96   : > { %3003 = vset.pattern.permute.xlu1 %v4567_v1  ;;  %v1165_v2 = vpop.permute.xlu1 %1164  ;;  %v3402_v11 = vmul.f32 %v3337_v33, %v1177_v58  ;;  %v3405_v12 = vmul.f32 %v3339_v34, %v1177_v58  ;;  %v3411_v13 = vmul.f32 %v3343_v36, %v1177_v58 }
  0x97   : > { %796 = vperm.xlu1 %3003, %v3271_v50   ;;  %v3408_v50 = vmul.f32 %v3341_v35, %v1177_v58  ;;  %v3414_v14 = vmul.f32 %v3337_v33, %v1165_v2  ;;  %v3417_v15 = vmul.f32 %v3341_v35, %v1165_v2  ;;  %v3420_v17 = vmul.f32 %v3339_v34, %v1165_v2 }
  0x98   : > { %4586 = vst [vmem:[#allocation7_spill] sm:$0xff] %v3402_v11  ;;  %4587 = vst [vmem:[#allocation8_spill] sm:$0xff] %v3405_v12  ;;  %v3423_v19 = vmul.f32 %v3343_v36, %v1165_v2 }
  0x99   : > { %4588 = vst [vmem:[#allocation9_spill] sm:$0xff] %v3408_v50  ;;  %4589 = vst [vmem:[#allocation10_spill] sm:$0xff] %v3411_v13 }
  0x9a   : > { %v267_v16 = vpop.permute.xlu0 %266 }
  0x9b   : > { %v462_v20 = vmul.f32 %v3346_v37, %v267_v16  ;;  %v463_v21 = vmul.f32 %v3348_v38, %v267_v16  ;;  %v464_v22 = vmul.f32 %v3350_v39, %v267_v16  ;;  %v465_v23 = vmul.f32 %v3352_v40, %v267_v16  ;;  %800 = vperm.xlu1 %3003, %v3258_v45   ;;  %v277_v24 = vpop.permute.xlu1 %276 }
  0x9c   : > { %v470_v25 = vmul.f32 %v3346_v37, %v277_v24  ;;  %v471_v30 = vmul.f32 %v3348_v38, %v277_v24  ;;  %v472_v31 = vmul.f32 %v3350_v39, %v277_v24  ;;  %v473_v32 = vmul.f32 %v3352_v40, %v277_v24 }
  0x9d   : > { %v611_v41 = vadd.f32 %v3355_v42, %v462_v20  ;;  %v612_v58 = vadd.f32 %v3357_v43, %v463_v21  ;;  %v613_v2 = vadd.f32 %v3359_v44, %v464_v22  ;;  %v614_v1 = vadd.f32 %v3361_v46, %v465_v23 }
  0x9e   : > { %v619_v16 = vadd.f32 %v3355_v42, %v470_v25  ;;  %v620_v18 = vadd.f32 %v3357_v43, %v471_v30  ;;  %v621_v0 = vadd.f32 %v3359_v44, %v472_v31  ;;  %v622_v60 = vadd.f32 %v3361_v46, %v473_v32  ;;  %v272_v56 = vpop.permute.xlu0 %271 }
  0x9f   : > { %v1031_v50 = vadd.f32 %v903_v47, %v611_v41  ;;  %v3442_v11 = vadd.f32 %v905_v49, %v613_v2  ;;  %v466_v20 = vmul.f32 %v3346_v37, %v272_v56  ;;  %v467_v21 = vmul.f32 %v3348_v38, %v272_v56 }
  0xa0   : > { %v4590_v24 = vmov 2   ;;  %v468_v22 = vmul.f32 %v3350_v39, %v272_v56  ;;  %v469_v23 = vmul.f32 %v3352_v40, %v272_v56  ;;  %v749_v25 = vpop.permute.xlu1 %748  ;;  %v1032_v30 = vadd.f32 %v904_v48, %v612_v58 }
  0xa1   : > { %3004 = vset.pattern.permute.xlu1 %v4590_v24  ;;  %v1034_v31 = vadd.f32 %v906_v57, %v614_v1  ;;  %v615_v32 = vadd.f32 %v3355_v42, %v466_v20  ;;  %v616_v47 = vadd.f32 %v3357_v43, %v467_v21  ;;  %v911_v49 = vmul.f32 %v3325_v26, %v749_v25 }
  0xa2   : > { %1220 = vperm.xlu1 %3004, %v3258_v45   ;;  %v912_v41 = vmul.f32 %v3327_v27, %v749_v25  ;;  %v617_v2 = vadd.f32 %v3359_v44, %v468_v22  ;;  %v618_v13 = vadd.f32 %v3361_v46, %v469_v23  ;;  %v913_v56 = vmul.f32 %v3329_v28, %v749_v25  ;;  %v282_v12 = vpop.permute.xlu0 %281 }
  0xa3   : > { %v914_v45 = vmul.f32 %v3331_v29, %v749_v25  ;;  %v1035_v48 = vadd.f32 %v907_v3, %v615_v32  ;;  %v3458_v1 = vadd.f32 %v911_v49, %v619_v16  ;;  %v474_v58 = vmul.f32 %v3346_v37, %v282_v12  ;;  %v257_v25 = vld [vmem:[%s3146_s7 + $0xe0] sm:$0xff] }
  0xa4   : > { %v3460_v57 = vadd.f32 %v912_v41, %v620_v18  ;;  %v3463_v20 = vadd.f32 %v909_v5, %v617_v2  ;;  %v3465_v21 = vadd.f32 %v913_v56, %v621_v0  ;;  %v475_v22 = vmul.f32 %v3348_v38, %v282_v12  ;;  %v753_v55 = vpop.permute.xlu1 %752  ;;  %1272 = vperm.xlu0 %3022, %v257_v25  }
  0xa5   : > { %v3467_v53 = vadd.f32 %v914_v45, %v622_v60  ;;  %v4592_v23 = vmov 0   ;;  %v476_v3 = vmul.f32 %v3350_v39, %v282_v12  ;;  %v477_v16 = vmul.f32 %v3352_v40, %v282_v12 }
  0xa6   : > { %4591 = vst [vmem:[#allocation11_spill] sm:$0xff] %v3465_v21  ;;  %3005 = vset.pattern.permute.xlu1 %v4592_v23  ;;  %v623_v18 = vadd.f32 %v3355_v42, %v474_v58  ;;  %v915_v32 = vmul.f32 %v3325_v26, %v753_v55  ;;  %v624_v0 = vadd.f32 %v3357_v43, %v475_v22  ;;  %v4593_v25 = vmov 1  }
  0xa7   : > { %346 = vperm.xlu1 %3005, %v3275_v51   ;;  %v916_v60 = vmul.f32 %v3327_v27, %v753_v55  ;;  %v917_v5 = vmul.f32 %v3329_v28, %v753_v55  ;;  %v918_v49 = vmul.f32 %v3331_v29, %v753_v55  ;;  %v625_v41 = vadd.f32 %v3359_v44, %v476_v3 }
  0xa8   : > { %v626_v12 = vadd.f32 %v3361_v46, %v477_v16  ;;  %v3483_v2 = vadd.f32 %v915_v32, %v623_v18  ;;  %v1036_v56 = vadd.f32 %v3382_v4, %v616_v47  ;;  %v1452_v58 = vadd.f32 %v3371_v61, %v1032_v30  ;;  %v258_v4 = vld [vmem:[%s3146_s7 + $0xe8] sm:$0xff]  ;;  %3027 = vset.pattern.permute.xlu0 %v4592_v23 }
  0xa9   : > { %v3486_v45 = vadd.f32 %v916_v60, %v624_v0  ;;  %v1038_v22 = vadd.f32 %v3386_v6, %v618_v13  ;;  %v1454_v9 = vadd.f32 %v3377_v63, %v1034_v31  ;;  %v3491_v21 = vadd.f32 %v917_v5, %v625_v41  ;;  %v1173_v3 = vpop.permute.xlu1 %1172  ;;  %411 = vperm.xlu0 %3027, %v258_v4  }
  0xaa   : > { %v3493_v55 = vadd.f32 %v918_v49, %v626_v12  ;;  %v1456_v16 = vadd.f32 %v3420_v17, %v1036_v56  ;;  %v1451_v18 = vadd.f32 %v3368_v59, %v1031_v50  ;;  %v3500_v47 = vmul.f32 %v3337_v33, %v1173_v3 }
  0xab   : > { %3006 = vset.pattern.permute.xlu1 %v4593_v25  ;;  %v1336_v61 = vmul.f32 %v3339_v34, %v1173_v3  ;;  %v3504_v6 = vmul.f32 %v3341_v35, %v1173_v3  ;;  %v3507_v63 = vmul.f32 %v3343_v36, %v1173_v3  ;;  %vm1580_vm0 = vcmp.ge.f32.partialorder %v1452_v58, 0.0 }
  0xac   : > { %804 = vperm.xlu1 %3006, %v3275_v51   ;;  %vm1584_vm1 = vcmp.ge.f32.partialorder %v1456_v16, 0.0  ;;  %v1708_v13 = vmul.f32 0.01, %v1452_v58  ;;  %v1712_v17 = vmul.f32 0.01, %v1456_v16  ;;  %v1458_v59 = vadd.f32 %v3423_v19, %v1038_v22  ;;  %v292_v22 = vpop.permute.xlu0 %291 }
  0xad   : > { %vm1582_vm2 = vcmp.ge.f32.partialorder %v1454_v9, 0.0  ;;  %v1710_v50 = vmul.f32 0.01, %v1454_v9  ;;  %v1455_v30 = vadd.f32 %v3414_v14, %v1035_v48  ;;  %vm1579_vm3 = vcmp.ge.f32.partialorder %v1451_v18, 0.0 }
  0xae   : > { %v1836_v31 = vsel %vm1580_vm0, %v1452_v58, %v1708_v13  ;;  %v1840_v32 = vsel %vm1584_vm1, %v1456_v16, %v1712_v17  ;;  %v1707_v0 = vmul.f32 0.01, %v1451_v18  ;;  %vm1586_vm4 = vcmp.ge.f32.partialorder %v1458_v59, 0.0  ;;  %v287_v49 = vpop.permute.xlu1 %286 }
  0xaf   : > { %v1964_v60 = vpack.c.bf16 %v1840_v32, %v1836_v31  ;;  %v1714_v51 = vmul.f32 0.01, %v1458_v59  ;;  %v1838_v5 = vsel %vm1582_vm2, %v1454_v9, %v1710_v50  ;;  %vm1583_vm5 = vcmp.ge.f32.partialorder %v1455_v30, 0.0 }
  0xb0   : > { %808 = vperm.xlu1 %3006, %v3289_v54   ;;  %v1711_v41 = vmul.f32 0.01, %v1455_v30  ;;  %v1835_v12 = vsel %vm1579_vm3, %v1451_v18, %v1707_v0  ;;  %v1453_v19 = vadd.f32 %v3374_v62, %v3442_v11  ;;  %v1457_v48 = vadd.f32 %v3417_v15, %v3463_v20 }
  0xb1   : > { %2322 = vmatprep.mubr.bf16.mxu0 %v1964_v60  ;;  %v1842_v14 = vsel %vm1586_vm4, %v1458_v59, %v1714_v51  ;;  %v478_v56 = vmul.f32 %v3346_v37, %v287_v49  ;;  %v479_v58 = vmul.f32 %v3348_v38, %v287_v49  ;;  %v480_v13 = vmul.f32 %v3350_v39, %v287_v49 }
  0xb2   : > { %v1966_v9 = vpack.c.bf16 %v1842_v14, %v1838_v5  ;;  %v1839_v3 = vsel %vm1583_vm5, %v1455_v30, %v1711_v41  ;;  %vm1581_vm6 = vcmp.ge.f32.partialorder %v1453_v19, 0.0  ;;  %v1709_v16 = vmul.f32 0.01, %v1453_v19 }
  0xb3   : > { %v1963_v4 = vpack.c.bf16 %v1839_v3, %v1835_v12  ;;  %vm1585_vm7 = vcmp.ge.f32.partialorder %v1457_v48, 0.0  ;;  %v1713_v18 = vmul.f32 0.01, %v1457_v48  ;;  %v481_v11 = vmul.f32 %v3352_v40, %v287_v49  ;;  %v757_v17 = vpop.permute.xlu1 %756 }
  0xb4   : > { %3007 = vset.pattern.permute.xlu1 %v4590_v24  ;;  %2483 = vmatprep.mubr.bf16.mxu1 %v1966_v9  ;;  %v1837_v62 = vsel %vm1581_vm6, %v1453_v19, %v1709_v16  ;;  %v627_v15 = vadd.f32 %v3355_v42, %v478_v56  ;;  %v628_v20 = vadd.f32 %v3357_v43, %v479_v58  ;;  %v302_v19 = vpop.permute.xlu0 %301 }
  0xb5   : > { %2323 = vmatmul.mubr.bf16.vlgmr.msra.gmra.mxu0 %v1963_v4  ;;  %v1841_v59 = vsel %vm1585_vm7, %v1457_v48, %v1713_v18  ;;  %v629_v50 = vadd.f32 %v3359_v44, %v480_v13  ;;  %v482_v30 = vmul.f32 %v3346_v37, %v292_v22  ;;  %v483_v31 = vmul.f32 %v3348_v38, %v292_v22 }
  0xb6   : > { %v1965_v32 = vpack.c.bf16 %v1841_v59, %v1837_v62  ;;  %v630_v0 = vadd.f32 %v3361_v46, %v481_v11  ;;  %v484_v60 = vmul.f32 %v3350_v39, %v292_v22  ;;  %v485_v51 = vmul.f32 %v3352_v40, %v292_v22  ;;  %1228 = vperm.xlu1 %3007, %v3289_v54  }
  0xb7   : > { %v3533_v5 = vadd.f32 %v3355_v42, %v482_v30  ;;  %v3536_v49 = vadd.f32 %v3357_v43, %v483_v31  ;;  %v1460_v41 = vadd.f32 %v3393_v8, %v3460_v57  ;;  %v1464_v12 = vadd.f32 %v1336_v61, %v3486_v45  ;;  %v3551_v58 = vpop.permute.xlu1 %760 }
  0xb8   : > { %2484 = vmatmul.mubr.bf16.vlgmr.msra.gmra.mxu1 %v1965_v32  ;;  %v3542_v14 = vadd.f32 %v3359_v44, %v484_v60  ;;  %v3545_v48 = vadd.f32 %v3361_v46, %v485_v51  ;;  %v1462_v54 = vadd.f32 %v3399_v10, %v3467_v53  ;;  %v1466_v56 = vadd.f32 %v3507_v63, %v3493_v55  ;;  %v260_v55 = vld [vmem:[%s3146_s7 + $0xf8] sm:$0xff]  ;;  %v312_v59 = vpop.permute.xlu0 %311 }
  0xb9   : > { %vm1588_vm8 = vcmp.ge.f32.partialorder %v1460_v41, 0.0  ;;  %vm1592_vm9 = vcmp.ge.f32.partialorder %v1464_v12, 0.0  ;;  %v1716_v8 = vmul.f32 0.01, %v1460_v41  ;;  %v1720_v57 = vmul.f32 0.01, %v1464_v12  ;;  %421 = vperm.xlu0 %3027, %v260_v55  }
  0xba   : > { %vm1590_vm10 = vcmp.ge.f32.partialorder %v1462_v54, 0.0  ;;  %vm1594_vm11 = vcmp.ge.f32.partialorder %v1466_v56, 0.0  ;;  %v1718_v45 = vmul.f32 0.01, %v1462_v54  ;;  %v1722_v61 = vmul.f32 0.01, %v1466_v56  ;;  %3008 = vset.pattern.permute.xlu1 %v4592_v23 }
  0xbb   : > { %v1844_v22 = vsel %vm1588_vm8, %v1460_v41, %v1716_v8  ;;  %v1848_v9 = vsel %vm1592_vm9, %v1464_v12, %v1720_v57  ;;  %v919_v53 = vmul.f32 %v3325_v26, %v757_v17  ;;  %v920_v10 = vmul.f32 %v3327_v27, %v757_v17  ;;  %356 = vperm.xlu1 %3008, %v3280_v52  }
  0xbc   : > { %v1968_v63 = vpack.c.bf16 %v1848_v9, %v1844_v22  ;;  %v1846_v3 = vsel %vm1590_vm10, %v1462_v54, %v1718_v45  ;;  %v1850_v16 = vsel %vm1594_vm11, %v1466_v56, %v1722_v61  ;;  %v921_v4 = vmul.f32 %v3329_v28, %v757_v17  ;;  %v3564_v30 = vpop.permute.xlu1 %1180  ;;  %v4594_v56 = vld [vmem:[#allocation11_spill] sm:$0xff] }
  0xbd   : > { %v1970_v18 = vpack.c.bf16 %v1850_v16, %v1846_v3  ;;  %v922_v13 = vmul.f32 %v3331_v29, %v757_v17  ;;  %v3560_v62 = vadd.f32 %v919_v53, %v627_v15  ;;  %v3562_v11 = vadd.f32 %v920_v10, %v628_v20  ;;  %3031 = vset.pattern.permute.xlu0 %v4590_v24  ;;  %v322_v53 = vpop.permute.xlu0 %321 }
  0xbe   : > { %2330 = vmatprep.mubr.bf16.mxu0 %v1968_v63  ;;  %v3566_v31 = vadd.f32 %v921_v4, %v629_v50  ;;  %v490_v32 = vmul.f32 %v3346_v37, %v302_v19  ;;  %v491_v60 = vmul.f32 %v3348_v38, %v302_v19  ;;  %v492_v51 = vmul.f32 %v3350_v39, %v302_v19  ;;  %v4596_v4 = vld [vmem:[#allocation3_spill] sm:$0xff] }
  0xbf   : > { %2491 = vmatprep.mubr.bf16.mxu1 %v1970_v18  ;;  %v3571_v41 = vadd.f32 %v922_v13, %v630_v0  ;;  %v493_v15 = vmul.f32 %v3352_v40, %v302_v19  ;;  %v1459_v20 = vadd.f32 %v3390_v7, %v3458_v1  ;;  %v1463_v17 = vadd.f32 %v3500_v47, %v3483_v2  ;;  %v4595_v0 = vld [vmem:[#allocation6_spill] sm:$0xff]  ;;  %v259_v1 = vld [vmem:[%s3146_s7 + $0xf0] sm:$0xff] }
  0xc0   : > { %v3579_v50 = vadd.f32 %v3355_v42, %v490_v32  ;;  %v3582_v12 = vadd.f32 %v3357_v43, %v491_v60  ;;  %v3585_v54 = vadd.f32 %v3359_v44, %v492_v51  ;;  %v1461_v8 = vadd.f32 %v4595_v0, %v4594_v56  ;;  %3009 = vset.pattern.permute.xlu1 %v4593_v25 }
  0xc1   : > { %v3591_v19 = vadd.f32 %v3361_v46, %v493_v15  ;;  %vm1587_vm12 = vcmp.ge.f32.partialorder %v1459_v20, 0.0  ;;  %vm1591_vm13 = vcmp.ge.f32.partialorder %v1463_v17, 0.0  ;;  %v1715_v7 = vmul.f32 0.01, %v1459_v20  ;;  %812 = vperm.xlu1 %3009, %v3280_v52   ;;  %v297_v45 = vpop.permute.xlu1 %296  ;;  %1280 = vperm.xlu0 %3031, %v259_v1  }
  0xc2   : > { %v1719_v2 = vmul.f32 0.01, %v1463_v17  ;;  %v1465_v47 = vadd.f32 %v3504_v6, %v3491_v21  ;;  %vm1589_vm14 = vcmp.ge.f32.partialorder %v1461_v8, 0.0  ;;  %v1717_v57 = vmul.f32 0.01, %v1461_v8 }
  0xc3   : > { %v1843_v61 = vsel %vm1587_vm12, %v1459_v20, %v1715_v7  ;;  %v923_v22 = vmul.f32 %v3325_v26, %v3551_v58  ;;  %v924_v9 = vmul.f32 %v3327_v27, %v3551_v58  ;;  %v925_v52 = vmul.f32 %v3329_v28, %v3551_v58  ;;  %v332_v7 = vpop.permute.xlu0 %331 }
  0xc4   : > { %v1847_v10 = vsel %vm1591_vm13, %v1463_v17, %v1719_v2  ;;  %vm1593_vm15 = vcmp.ge.f32.partialorder %v1465_v47, 0.0  ;;  %v1721_v55 = vmul.f32 0.01, %v1465_v47  ;;  %v1845_v21 = vsel %vm1589_vm14, %v1461_v8, %v1717_v57 }
  0xc5   : > { %v1967_v6 = vpack.c.bf16 %v1847_v10, %v1843_v61  ;;  %v926_v63 = vmul.f32 %v3331_v29, %v3551_v58  ;;  %v3608_v3 = vadd.f32 %v923_v22, %v3533_v5  ;;  %v1052_v16 = vadd.f32 %v924_v9, %v3536_v49  ;;  %816 = vperm.xlu1 %3009, %v4596_v4  }
  0xc6   : > { %v1849_v18 = vsel %vm1593_vm15, %v1465_v47, %v1721_v55  ;;  %v3613_v13 = vadd.f32 %v925_v52, %v3542_v14  ;;  %v498_v32 = vmul.f32 %v3346_v37, %v312_v59  ;;  %v499_v60 = vmul.f32 %v3348_v38, %v312_v59  ;;  %v3620_v20 = vpop.permute.xlu1 %764 }
  0xc7   : > { %2331 = vmatmul.mubr.bf16.gmra.mxu0 %v1967_v6  ;;  %v1969_v51 = vpack.c.bf16 %v1849_v18, %v1845_v21  ;;  %v1054_v15 = vadd.f32 %v926_v63, %v3545_v48  ;;  %v500_v58 = vmul.f32 %v3350_v39, %v312_v59  ;;  %v501_v5 = vmul.f32 %v3352_v40, %v312_v59 }
  0xc8   : > { %v3623_v49 = vadd.f32 %v3355_v42, %v498_v32  ;;  %v3626_v14 = vadd.f32 %v3357_v43, %v499_v60  ;;  %v506_v17 = vmul.f32 %v3346_v37, %v322_v53  ;;  %v507_v56 = vmul.f32 %v3348_v38, %v322_v53 }
  0xc9   : > { %2492 = vmatmul.mubr.bf16.gmra.mxu1 %v1969_v51  ;;  %v3631_v0 = vadd.f32 %v3359_v44, %v500_v58  ;;  %v3634_v48 = vadd.f32 %v3361_v46, %v501_v5  ;;  %v508_v59 = vmul.f32 %v3350_v39, %v322_v53  ;;  %v509_v8 = vmul.f32 %v3352_v40, %v322_v53 }
  0xca   : > { %v3639_v1 = vadd.f32 %v3355_v42, %v506_v17  ;;  %v3642_v2 = vadd.f32 %v3357_v43, %v507_v56  ;;  %v3646_v47 = vmul.f32 %v3337_v33, %v3564_v30  ;;  %v1344_v57 = vmul.f32 %v3339_v34, %v3564_v30  ;;  %3010 = vset.pattern.permute.xlu1 %v4590_v24  ;;  %v3662_v53 = vpop.permute.xlu1 %768 }
  0xcb   : > { %v3652_v61 = vadd.f32 %v3359_v44, %v508_v59  ;;  %v3655_v22 = vadd.f32 %v3361_v46, %v509_v8  ;;  %v1345_v9 = vmul.f32 %v3341_v35, %v3564_v30  ;;  %v1346_v52 = vmul.f32 %v3343_v36, %v3564_v30  ;;  %1236 = vperm.xlu1 %3010, %v4596_v4   ;;  %v342_v59 = vpop.permute.xlu0 %341 }
  0xcc   : > { %v514_v10 = vmul.f32 %v3346_v37, %v332_v7  ;;  %v515_v55 = vmul.f32 %v3348_v38, %v332_v7  ;;  %v516_v21 = vmul.f32 %v3350_v39, %v332_v7  ;;  %v517_v6 = vmul.f32 %v3352_v40, %v332_v7 }
  0xcd   : > { %4597 = vst [vmem:[#allocation11_spill] sm:$0xff] %v3655_v22  ;;  %v486_v63 = vmul.f32 %v3346_v37, %v297_v45  ;;  %v487_v18 = vmul.f32 %v3348_v38, %v297_v45  ;;  %v488_v32 = vmul.f32 %v3350_v39, %v297_v45  ;;  %v489_v30 = vmul.f32 %v3352_v40, %v297_v45 }
  0xce   : > { %v3673_v4 = vadd.f32 %v3355_v42, %v514_v10  ;;  %v3676_v60 = vadd.f32 %v3357_v43, %v515_v55  ;;  %v3679_v51 = vadd.f32 %v3359_v44, %v516_v21  ;;  %v3682_v58 = vadd.f32 %v3361_v46, %v517_v6  ;;  %v4602_v21 = vld [vmem:[#allocation2_spill] sm:$0xff] }
  0xcf   : > { %v635_v5 = vadd.f32 %v3355_v42, %v486_v63  ;;  %v636_v17 = vadd.f32 %v3357_v43, %v487_v18  ;;  %v637_v56 = vadd.f32 %v3359_v44, %v488_v32  ;;  %v638_v45 = vadd.f32 %v3361_v46, %v489_v30  ;;  %3011 = vset.pattern.permute.xlu1 %v4592_v23  ;;  %v3694_v6 = vpop.permute.xlu1 %1188  ;;  %v4603_v63 = vld [vmem:[#allocation8_spill] sm:$0xff]  ;;  %v4604_v30 = vld [vmem:[#allocation10_spill] sm:$0xff] }
  0xd0   : > { %4598 = vst [vmem:[#allocation6_spill] sm:$0xff] %v3673_v4  ;;  %4599 = vst [vmem:[#allocation3_spill] sm:$0xff] %v3676_v60  ;;  %v522_v8 = vmul.f32 %v3346_v37, %v342_v59  ;;  %v523_v7 = vmul.f32 %v3348_v38, %v342_v59  ;;  %v524_v10 = vmul.f32 %v3350_v39, %v342_v59  ;;  %366 = vperm.xlu1 %3011, %v4602_v21  }
  0xd1   : > { %4600 = vst [vmem:[#allocation12_spill] sm:$0xff] %v3679_v51  ;;  %4601 = vst [vmem:[#allocation13_spill] sm:$0xff] %v3682_v58  ;;  %v525_v55 = vmul.f32 %v3352_v40, %v342_v59  ;;  %v1468_v18 = vadd.f32 %v4603_v63, %v3562_v11  ;;  %v1472_v32 = vadd.f32 %v1344_v57, %v1052_v16 }
  0xd2   : > { %v1470_v58 = vadd.f32 %v4604_v30, %v3571_v41  ;;  %v1474_v51 = vadd.f32 %v1346_v52, %v1054_v15  ;;  %v3701_v60 = vadd.f32 %v3355_v42, %v522_v8  ;;  %v3704_v4 = vadd.f32 %v3357_v43, %v523_v7 }
  0xd3   : > { %v3707_v59 = vadd.f32 %v3359_v44, %v524_v10  ;;  %v3710_v22 = vadd.f32 %v3361_v46, %v525_v55  ;;  %vm1596_vm0 = vcmp.ge.f32.partialorder %v1468_v18, 0.0  ;;  %vm1600_vm1 = vcmp.ge.f32.partialorder %v1472_v32, 0.0 }
  0xd4   : > { %4605 = vst [vmem:[#allocation2_spill] sm:$0xff] %v3704_v4  ;;  %v1724_v11 = vmul.f32 0.01, %v1468_v18  ;;  %v1728_v16 = vmul.f32 0.01, %v1472_v32  ;;  %vm1598_vm2 = vcmp.ge.f32.partialorder %v1470_v58, 0.0  ;;  %3012 = vset.pattern.permute.xlu1 %v4593_v25  ;;  %v927_v8 = vmul.f32 %v3325_v26, %v3620_v20  ;;  %v3718_v10 = vpop.permute.xlu1 %306 }
  0xd5   : > { %4606 = vst [vmem:[#allocation8_spill] sm:$0xff] %v3707_v59  ;;  %4607 = vst [vmem:[#allocation10_spill] sm:$0xff] %v3710_v22  ;;  %vm1602_vm3 = vcmp.ge.f32.partialorder %v1474_v51, 0.0  ;;  %v1726_v41 = vmul.f32 0.01, %v1470_v58  ;;  %v928_v7 = vmul.f32 %v3327_v27, %v3620_v20  ;;  %820 = vperm.xlu1 %3012, %v4602_v21   ;;  %v929_v22 = vmul.f32 %v3329_v28, %v3620_v20  ;;  %v4609_v21 = vld [vmem:[#allocation9_spill] sm:$0xff] }
  0xd6   : > { %v1730_v15 = vmul.f32 0.01, %v1474_v51  ;;  %v1852_v57 = vsel %vm1596_vm0, %v1468_v18, %v1724_v11  ;;  %v1856_v52 = vsel %vm1600_vm1, %v1472_v32, %v1728_v16  ;;  %v930_v18 = vmul.f32 %v3331_v29, %v3620_v20  ;;  %v4608_v32 = vld [vmem:[#allocation7_spill] sm:$0xff]  ;;  %v1185_v20 = vpop.permute.xlu0 %1184 }
  0xd7   : > { %v1972_v55 = vpack.c.bf16 %v1856_v52, %v1852_v57  ;;  %v1854_v63 = vsel %vm1598_vm2, %v1470_v58, %v1726_v41  ;;  %v1467_v11 = vadd.f32 %v4608_v32, %v3560_v62  ;;  %v1471_v16 = vadd.f32 %v3646_v47, %v3608_v3  ;;  %v4610_v52 = vld [vmem:[#allocation4_spill] sm:$0xff] }
  0xd8   : > { %v1858_v30 = vsel %vm1602_vm3, %v1474_v51, %v1730_v15  ;;  %v1469_v4 = vadd.f32 %v4609_v21, %v3566_v31  ;;  %v1473_v58 = vadd.f32 %v1345_v9, %v3613_v13  ;;  %v1055_v51 = vadd.f32 %v927_v8, %v635_v5 }
  0xd9   : > { %v1974_v59 = vpack.c.bf16 %v1858_v30, %v1854_v63  ;;  %2338 = vmatprep.mubr.bf16.mxu0 %v1972_v55  ;;  %v1056_v41 = vadd.f32 %v928_v7, %v636_v17  ;;  %vm1595_vm4 = vcmp.ge.f32.partialorder %v1467_v11, 0.0  ;;  %vm1599_vm5 = vcmp.ge.f32.partialorder %v1471_v16, 0.0  ;;  %824 = vperm.xlu1 %3012, %v4610_v52   ;;  %v3732_v47 = vpop.permute.xlu1 %772 }
  0xda   : > { %v1723_v15 = vmul.f32 0.01, %v1467_v11  ;;  %v1727_v57 = vmul.f32 0.01, %v1471_v16  ;;  %vm1597_vm6 = vcmp.ge.f32.partialorder %v1469_v4, 0.0  ;;  %vm1601_vm7 = vcmp.ge.f32.partialorder %v1473_v58, 0.0 }
  0xdb   : > { %2499 = vmatprep.mubr.bf16.mxu1 %v1974_v59  ;;  %v1725_v62 = vmul.f32 0.01, %v1469_v4  ;;  %v1729_v3 = vmul.f32 0.01, %v1473_v58  ;;  %v1057_v63 = vadd.f32 %v929_v22, %v637_v56  ;;  %v1058_v13 = vadd.f32 %v930_v18, %v638_v45 }
  0xdc   : > { %v1851_v55 = vsel %vm1595_vm4, %v1467_v11, %v1723_v15  ;;  %v1855_v31 = vsel %vm1599_vm5, %v1471_v16, %v1727_v57  ;;  %v1347_v59 = vmul.f32 %v3337_v33, %v1185_v20  ;;  %v1348_v7 = vmul.f32 %v3339_v34, %v1185_v20 }
  0xdd   : > { %v1971_v9 = vpack.c.bf16 %v1855_v31, %v1851_v55  ;;  %v1853_v5 = vsel %vm1597_vm6, %v1469_v4, %v1725_v62  ;;  %v1857_v17 = vsel %vm1601_vm7, %v1473_v58, %v1729_v3  ;;  %v1349_v30 = vmul.f32 %v3341_v35, %v1185_v20  ;;  %3014 = vset.pattern.permute.xlu1 %v4590_v24  ;;  %v3747_v45 = vpop.permute.xlu1 %776 }
  0xde   : > { %v1973_v8 = vpack.c.bf16 %v1857_v17, %v1853_v5  ;;  %v1350_v32 = vmul.f32 %v3343_v36, %v1185_v20  ;;  %v3739_v21 = vadd.f32 %v1347_v59, %v1055_v51  ;;  %v931_v22 = vmul.f32 %v3325_v26, %v3662_v53  ;;  %1244 = vperm.xlu1 %3014, %v4610_v52  }
  0xdf   : > { %2339 = vmatmul.mubr.bf16.gmra.mxu0 %v1971_v9  ;;  %v932_v4 = vmul.f32 %v3327_v27, %v3662_v53  ;;  %v933_v56 = vmul.f32 %v3329_v28, %v3662_v53  ;;  %v1476_v18 = vadd.f32 %v1348_v7, %v1056_v41  ;;  %v3749_v11 = vadd.f32 %v1349_v30, %v1057_v63  ;;  %v4611_v7 = vld [vmem:[#allocation5_spill] sm:$0xff] }
  0xe0   : > { %2500 = vmatmul.mubr.bf16.gmra.mxu1 %v1973_v8  ;;  %v1478_v16 = vadd.f32 %v1350_v32, %v1058_v13  ;;  %v934_v58 = vmul.f32 %v3331_v29, %v3662_v53  ;;  %v1059_v51 = vadd.f32 %v931_v22, %v3579_v50  ;;  %v1351_v20 = vmul.f32 %v3337_v33, %v3694_v6 }
  0xe1   : > { %v1060_v15 = vadd.f32 %v932_v4, %v3582_v12  ;;  %v1061_v57 = vadd.f32 %v933_v56, %v3585_v54  ;;  %v1352_v41 = vmul.f32 %v3339_v34, %v3694_v6  ;;  %v1353_v3 = vmul.f32 %v3341_v35, %v3694_v6 }
  0xe2   : > { %v1062_v62 = vadd.f32 %v934_v58, %v3591_v19  ;;  %v1354_v50 = vmul.f32 %v3343_v36, %v3694_v6  ;;  %v1479_v53 = vadd.f32 %v1351_v20, %v1059_v51  ;;  %v494_v12 = vmul.f32 %v3346_v37, %v3718_v10  ;;  %v3774_v13 = vpop.permute.xlu1 %1196  ;;  %3015 = vset.pattern.permute.xlu1 %v4592_v23 }
  0xe3   : > { %v495_v54 = vmul.f32 %v3348_v38, %v3718_v10  ;;  %v496_v52 = vmul.f32 %v3350_v39, %v3718_v10  ;;  %v1480_v19 = vadd.f32 %v1352_v41, %v1060_v15  ;;  %v1481_v55 = vadd.f32 %v1353_v3, %v1061_v57  ;;  %376 = vperm.xlu1 %3015, %v4611_v7  }
  0xe4   : > { %v1482_v31 = vadd.f32 %v1354_v50, %v1062_v62  ;;  %v497_v63 = vmul.f32 %v3352_v40, %v3718_v10  ;;  %v643_v6 = vadd.f32 %v3355_v42, %v494_v12  ;;  %vm1604_vm8 = vcmp.ge.f32.partialorder %v1476_v18, 0.0  ;;  %v1193_v50 = vpop.permute.xlu0 %1192 }
  0xe5   : > { %v644_v9 = vadd.f32 %v3357_v43, %v495_v54  ;;  %v645_v5 = vadd.f32 %v3359_v44, %v496_v52  ;;  %vm1608_vm9 = vcmp.ge.f32.partialorder %v1480_v19, 0.0  ;;  %v1732_v59 = vmul.f32 0.01, %v1476_v18 }
  0xe6   : > { %v646_v17 = vadd.f32 %v3361_v46, %v497_v63  ;;  %v1736_v8 = vmul.f32 0.01, %v1480_v19  ;;  %vm1606_vm10 = vcmp.ge.f32.partialorder %v1478_v16, 0.0  ;;  %vm1610_vm11 = vcmp.ge.f32.partialorder %v1482_v31, 0.0 }
  0xe7   : > { %v1734_v10 = vmul.f32 0.01, %v1478_v16  ;;  %v1738_v30 = vmul.f32 0.01, %v1482_v31  ;;  %v1860_v32 = vsel %vm1604_vm8, %v1476_v18, %v1732_v59  ;;  %v935_v4 = vmul.f32 %v3325_v26, %v3732_v47  ;;  %v317_v20 = vpop.permute.xlu1 %316  ;;  %3016 = vset.pattern.permute.xlu1 %v4593_v25 }
  0xe8   : > { %v1864_v22 = vsel %vm1608_vm9, %v1480_v19, %v1736_v8  ;;  %v936_v56 = vmul.f32 %v3327_v27, %v3732_v47  ;;  %v937_v57 = vmul.f32 %v3329_v28, %v3732_v47  ;;  %v938_v41 = vmul.f32 %v3331_v29, %v3732_v47  ;;  %828 = vperm.xlu1 %3016, %v4611_v7  }
  0xe9   : > { %v1976_v58 = vpack.c.bf16 %v1864_v22, %v1860_v32  ;;  %v1862_v51 = vsel %vm1606_vm10, %v1478_v16, %v1734_v10  ;;  %v1866_v15 = vsel %vm1610_vm11, %v1482_v31, %v1738_v30  ;;  %v1063_v3 = vadd.f32 %v935_v4, %v643_v6 }
  0xea   : > { %v1978_v62 = vpack.c.bf16 %v1866_v15, %v1862_v51  ;;  %v1064_v18 = vadd.f32 %v936_v56, %v644_v9  ;;  %v1065_v12 = vadd.f32 %v937_v57, %v645_v5  ;;  %vm1603_vm12 = vcmp.ge.f32.partialorder %v3739_v21, 0.0 }
  0xeb   : > { %2346 = vmatprep.mubr.bf16.mxu0 %v1976_v58  ;;  %vm1607_vm13 = vcmp.ge.f32.partialorder %v1479_v53, 0.0  ;;  %v1731_v16 = vmul.f32 0.01, %v3739_v21  ;;  %v1066_v54 = vadd.f32 %v938_v41, %v646_v17  ;;  %v1735_v52 = vmul.f32 0.01, %v1479_v53 }
  0xec   : > { %2507 = vmatprep.mubr.bf16.mxu1 %v1978_v62  ;;  %vm1605_vm14 = vcmp.ge.f32.partialorder %v3749_v11, 0.0  ;;  %vm1609_vm15 = vcmp.ge.f32.partialorder %v1481_v55, 0.0  ;;  %v1733_v19 = vmul.f32 0.01, %v3749_v11  ;;  %v1737_v31 = vmul.f32 0.01, %v1481_v55  ;;  %v781_v17 = vpop.permute.xlu1 %780 }
  0xed   : > { %v1859_v47 = vsel %vm1603_vm12, %v3739_v21, %v1731_v16  ;;  %v1355_v63 = vmul.f32 %v3337_v33, %v1193_v50  ;;  %v1863_v6 = vsel %vm1607_vm13, %v1479_v53, %v1735_v52  ;;  %v1356_v9 = vmul.f32 %v3339_v34, %v1193_v50  ;;  %v3065_v21 = vld [vmem:[%s3146_s7 + $0xb8] sm:$0xff] }
  0xee   : > { %v1357_v5 = vmul.f32 %v3341_v35, %v1193_v50  ;;  %v1358_v59 = vmul.f32 %v3343_v36, %v1193_v50  ;;  %v1975_v8 = vpack.c.bf16 %v1863_v6, %v1859_v47  ;;  %v1861_v7 = vsel %vm1605_vm14, %v3749_v11, %v1733_v19  ;;  %832 = vperm.xlu1 %3016, %v3065_v21  }
  0xef   : > { %v1865_v10 = vsel %vm1609_vm15, %v1481_v55, %v1737_v31  ;;  %v3802_v30 = vadd.f32 %v1355_v63, %v1063_v3  ;;  %v1484_v22 = vadd.f32 %v1356_v9, %v1064_v18  ;;  %v939_v56 = vmul.f32 %v3325_v26, %v3747_v45 }
  0xf0   : > { %v1977_v32 = vpack.c.bf16 %v1865_v10, %v1861_v7  ;;  %v3805_v4 = vadd.f32 %v1357_v5, %v1065_v12  ;;  %v1486_v53 = vadd.f32 %v1358_v59, %v1066_v54  ;;  %2347 = vmatmul.mubr.bf16.gmra.mxu0 %v1975_v8  ;;  %v940_v58 = vmul.f32 %v3327_v27, %v3747_v45  ;;  %v3823_v41 = vpop.permute.xlu1 %784 }
  0xf1   : > { %v941_v11 = vmul.f32 %v3329_v28, %v3747_v45  ;;  %v942_v55 = vmul.f32 %v3331_v29, %v3747_v45  ;;  %v1359_v51 = vmul.f32 %v3337_v33, %v3774_v13  ;;  %v1360_v15 = vmul.f32 %v3339_v34, %v3774_v13 }
  0xf2   : > { %2508 = vmatmul.mubr.bf16.gmra.mxu1 %v1977_v32  ;;  %v1361_v57 = vmul.f32 %v3341_v35, %v3774_v13  ;;  %v1362_v62 = vmul.f32 %v3343_v36, %v3774_v13  ;;  %v1067_v3 = vadd.f32 %v939_v56, %v3623_v49  ;;  %v1068_v18 = vadd.f32 %v940_v58, %v3626_v14 }
  0xf3   : > { %v1069_v45 = vadd.f32 %v941_v11, %v3631_v0  ;;  %v1070_v50 = vadd.f32 %v942_v55, %v3634_v48  ;;  %3017 = vset.pattern.permute.xlu1 %v4590_v24  ;;  %v502_v12 = vmul.f32 %v3346_v37, %v317_v20  ;;  %v503_v16 = vmul.f32 %v3348_v38, %v317_v20 }
  0xf4   : > { %v504_v54 = vmul.f32 %v3350_v39, %v317_v20  ;;  %v505_v13 = vmul.f32 %v3352_v40, %v317_v20  ;;  %1252 = vperm.xlu1 %3017, %v3065_v21   ;;  %v1487_v52 = vadd.f32 %v1359_v51, %v1067_v3  ;;  %v1488_v47 = vadd.f32 %v1360_v15, %v1068_v18  ;;  %v3066_v21 = vld [vmem:[%s3146_s7 + $0xc0] sm:$0xff] }
  0xf5   : > { %v1489_v49 = vadd.f32 %v1361_v57, %v1069_v45  ;;  %v1490_v19 = vadd.f32 %v1362_v62, %v1070_v50  ;;  %v651_v14 = vadd.f32 %v3355_v42, %v502_v12  ;;  %v652_v0 = vadd.f32 %v3357_v43, %v503_v16  ;;  %v1205_v9 = vpop.permute.xlu1 %1204  ;;  %v1201_v62 = vpop.permute.xlu0 %1200 }
  0xf6   : > { %v653_v48 = vadd.f32 %v3359_v44, %v504_v54  ;;  %v654_v31 = vadd.f32 %v3361_v46, %v505_v13  ;;  %vm1612_vm0 = vcmp.ge.f32.partialorder %v1484_v22, 0.0  ;;  %vm1616_vm1 = vcmp.ge.f32.partialorder %v1488_v47, 0.0 }
  0xf7   : > { %v1740_v63 = vmul.f32 0.01, %v1484_v22  ;;  %v1744_v6 = vmul.f32 0.01, %v1488_v47  ;;  %vm1614_vm2 = vcmp.ge.f32.partialorder %v1486_v53, 0.0  ;;  %vm1618_vm3 = vcmp.ge.f32.partialorder %v1490_v19, 0.0 }
  0xf8   : > { %v1742_v20 = vmul.f32 0.01, %v1486_v53  ;;  %v1746_v5 = vmul.f32 0.01, %v1490_v19  ;;  %3018 = vset.pattern.permute.xlu1 %v4592_v23  ;;  %v943_v7 = vmul.f32 %v3325_v26, %v781_v17  ;;  %v944_v10 = vmul.f32 %v3327_v27, %v781_v17 }
  0xf9   : > { %v1868_v59 = vsel %vm1612_vm0, %v1484_v22, %v1740_v63  ;;  %v1872_v8 = vsel %vm1616_vm1, %v1488_v47, %v1744_v6  ;;  %386 = vperm.xlu1 %3018, %v3066_v21   ;;  %v945_v11 = vmul.f32 %v3329_v28, %v781_v17  ;;  %v946_v51 = vmul.f32 %v3331_v29, %v781_v17 }
  0xfa   : > { %v1980_v32 = vpack.c.bf16 %v1872_v8, %v1868_v59  ;;  %v1870_v56 = vsel %vm1614_vm2, %v1486_v53, %v1742_v20  ;;  %v1874_v58 = vsel %vm1618_vm3, %v1490_v19, %v1746_v5  ;;  %v1071_v15 = vadd.f32 %v943_v7, %v651_v14  ;;  %v327_v18 = vpop.permute.xlu1 %326 }
  0xfb   : > { %v1982_v55 = vpack.c.bf16 %v1874_v58, %v1870_v56  ;;  %v1072_v57 = vadd.f32 %v944_v10, %v652_v0  ;;  %v1073_v22 = vadd.f32 %v945_v11, %v653_v48  ;;  %vm1611_vm4 = vcmp.ge.f32.partialorder %v3802_v30, 0.0  ;;  %v4612_v11 = vld [vmem:[#allocation11_spill] sm:$0xff] }
  0xfc   : > { %2354 = vmatprep.mubr.bf16.mxu0 %v1980_v32  ;;  %vm1615_vm5 = vcmp.ge.f32.partialorder %v1487_v52, 0.0  ;;  %v1739_v3 = vmul.f32 0.01, %v3802_v30  ;;  %v1074_v45 = vadd.f32 %v946_v51, %v654_v31  ;;  %v1743_v53 = vmul.f32 0.01, %v1487_v52  ;;  %v3067_v51 = vld [vmem:[%s3146_s7 + $0xc8] sm:$0xff] }
  0xfd   : > { %2515 = vmatprep.mubr.bf16.mxu1 %v1982_v55  ;;  %vm1613_vm6 = vcmp.ge.f32.partialorder %v3805_v4, 0.0  ;;  %vm1617_vm7 = vcmp.ge.f32.partialorder %v1489_v49, 0.0  ;;  %3019 = vset.pattern.permute.xlu1 %v4593_v25  ;;  %v1741_v50 = vmul.f32 0.01, %v3805_v4  ;;  %v1745_v12 = vmul.f32 0.01, %v1489_v49 }
  0xfe   : > { %v1867_v17 = vsel %vm1611_vm4, %v3802_v30, %v1739_v3  ;;  %v1363_v16 = vmul.f32 %v3337_v33, %v1201_v62  ;;  %836 = vperm.xlu1 %3019, %v3066_v21   ;;  %v1871_v54 = vsel %vm1615_vm5, %v1487_v52, %v1743_v53  ;;  %v1364_v13 = vmul.f32 %v3339_v34, %v1201_v62 }
  0xff   : > { %v1365_v47 = vmul.f32 %v3341_v35, %v1201_v62  ;;  %v1366_v19 = vmul.f32 %v3343_v36, %v1201_v62  ;;  %v1979_v14 = vpack.c.bf16 %v1871_v54, %v1867_v17  ;;  %v1869_v0 = vsel %vm1613_vm6, %v3805_v4, %v1741_v50  ;;  %v789_v5 = vpop.permute.xlu1 %788 }
 0x100   : > { %v1873_v48 = vsel %vm1617_vm7, %v1489_v49, %v1745_v12  ;;  %v3855_v31 = vadd.f32 %v1363_v16, %v1071_v15  ;;  %v1492_v63 = vadd.f32 %v1364_v13, %v1072_v57  ;;  %v947_v52 = vmul.f32 %v3325_v26, %v3823_v41 }
 0x101   : > { %v1981_v30 = vpack.c.bf16 %v1873_v48, %v1869_v0  ;;  %v3857_v6 = vadd.f32 %v1365_v47, %v1073_v22  ;;  %v1494_v20 = vadd.f32 %v1366_v19, %v1074_v45  ;;  %2355 = vmatmul.mubr.bf16.gmra.mxu0 %v1979_v14  ;;  %v948_v59 = vmul.f32 %v3327_v27, %v3823_v41 }
 0x102   : > { %v949_v4 = vmul.f32 %v3329_v28, %v3823_v41  ;;  %v950_v49 = vmul.f32 %v3331_v29, %v3823_v41  ;;  %v1367_v8 = vmul.f32 %v3337_v33, %v1205_v9  ;;  %v1368_v7 = vmul.f32 %v3339_v34, %v1205_v9  ;;  %840 = vperm.xlu1 %3019, %v3067_v51  }
 0x103   : > { %2516 = vmatmul.mubr.bf16.gmra.mxu1 %v1981_v30  ;;  %v1369_v10 = vmul.f32 %v3341_v35, %v1205_v9  ;;  %v1370_v21 = vmul.f32 %v3343_v36, %v1205_v9  ;;  %v1075_v32 = vadd.f32 %v947_v52, %v3639_v1  ;;  %v1076_v56 = vadd.f32 %v948_v59, %v3642_v2  ;;  %v3880_v22 = vpop.permute.xlu1 %792 }
 0x104   : > { %v1077_v58 = vadd.f32 %v949_v4, %v3652_v61  ;;  %v1078_v55 = vadd.f32 %v950_v49, %v4612_v11  ;;  %v510_v41 = vmul.f32 %v3346_v37, %v327_v18  ;;  %v511_v15 = vmul.f32 %v3348_v38, %v327_v18 }
 0x105   : > { %v512_v57 = vmul.f32 %v3350_v39, %v327_v18  ;;  %v513_v62 = vmul.f32 %v3352_v40, %v327_v18  ;;  %v1495_v9 = vadd.f32 %v1367_v8, %v1075_v32  ;;  %v1496_v1 = vadd.f32 %v1368_v7, %v1076_v56  ;;  %v1209_v7 = vpop.permute.xlu0 %1208  ;;  %v3068_v32 = vld [vmem:[%s3146_s7 + $0xd0] sm:$0xff] }
 0x106   : > { %v1497_v3 = vadd.f32 %v1369_v10, %v1077_v58  ;;  %v1498_v2 = vadd.f32 %v1370_v21, %v1078_v55  ;;  %v659_v61 = vadd.f32 %v3355_v42, %v510_v41  ;;  %v660_v45 = vadd.f32 %v3357_v43, %v511_v15  ;;  %3020 = vset.pattern.permute.xlu1 %v4590_v24 }
 0x107   : > { %v661_v53 = vadd.f32 %v3359_v44, %v512_v57  ;;  %v662_v17 = vadd.f32 %v3361_v46, %v513_v62  ;;  %vm1620_vm8 = vcmp.ge.f32.partialorder %v1492_v63, 0.0  ;;  %vm1624_vm9 = vcmp.ge.f32.partialorder %v1496_v1, 0.0  ;;  %1260 = vperm.xlu1 %3020, %v3067_v51  }
 0x108   : > { %v1748_v50 = vmul.f32 0.01, %v1492_v63  ;;  %v1752_v18 = vmul.f32 0.01, %v1496_v1  ;;  %vm1622_vm10 = vcmp.ge.f32.partialorder %v1494_v20, 0.0  ;;  %vm1626_vm11 = vcmp.ge.f32.partialorder %v1498_v2, 0.0  ;;  %v1213_v14 = vpop.permute.xlu1 %1212 }
 0x109   : > { %v1750_v12 = vmul.f32 0.01, %v1494_v20  ;;  %v1754_v16 = vmul.f32 0.01, %v1498_v2  ;;  %v951_v47 = vmul.f32 %v3325_v26, %v789_v5  ;;  %v952_v19 = vmul.f32 %v3327_v27, %v789_v5 }
 0x10a   : > { %v1876_v54 = vsel %vm1620_vm8, %v1492_v63, %v1748_v50  ;;  %v1880_v13 = vsel %vm1624_vm9, %v1496_v1, %v1752_v18  ;;  %v953_v52 = vmul.f32 %v3329_v28, %v789_v5  ;;  %v954_v4 = vmul.f32 %v3331_v29, %v789_v5 }
 0x10b   : > { %v1984_v0 = vpack.c.bf16 %v1880_v13, %v1876_v54  ;;  %v1878_v48 = vsel %vm1622_vm10, %v1494_v20, %v1750_v12  ;;  %v1882_v30 = vsel %vm1626_vm11, %v1498_v2, %v1754_v16  ;;  %v1079_v49 = vadd.f32 %v951_v47, %v659_v61  ;;  %3021 = vset.pattern.permute.xlu1 %v4592_v23  ;;  %v4613_v47 = vld [vmem:[#allocation6_spill] sm:$0xff] }
 0x10c   : > { %v1986_v59 = vpack.c.bf16 %v1882_v30, %v1878_v48  ;;  %v1080_v8 = vadd.f32 %v952_v19, %v660_v45  ;;  %v1081_v63 = vadd.f32 %v953_v52, %v661_v53  ;;  %vm1619_vm12 = vcmp.ge.f32.partialorder %v3855_v31, 0.0  ;;  %396 = vperm.xlu1 %3021, %v3068_v32   ;;  %v4615_v30 = vld [vmem:[#allocation12_spill] sm:$0xff] }
 0x10d   : > { %2362 = vmatprep.mubr.bf16.mxu0 %v1984_v0  ;;  %vm1623_vm13 = vcmp.ge.f32.partialorder %v1495_v9, 0.0  ;;  %v1747_v10 = vmul.f32 0.01, %v3855_v31  ;;  %v1082_v20 = vadd.f32 %v954_v4, %v662_v17  ;;  %v1751_v21 = vmul.f32 0.01, %v1495_v9  ;;  %v337_v55 = vpop.permute.xlu1 %336  ;;  %v4614_v0 = vld [vmem:[#allocation3_spill] sm:$0xff] }
 0x10e   : > { %2523 = vmatprep.mubr.bf16.mxu1 %v1986_v59  ;;  %vm1621_vm14 = vcmp.ge.f32.partialorder %v3857_v6, 0.0  ;;  %vm1625_vm15 = vcmp.ge.f32.partialorder %v1497_v3, 0.0  ;;  %v1749_v56 = vmul.f32 0.01, %v3857_v6  ;;  %v1753_v58 = vmul.f32 0.01, %v1497_v3 }
 0x10f   : > { %v1875_v5 = vsel %vm1619_vm12, %v3855_v31, %v1747_v10  ;;  %v1371_v11 = vmul.f32 %v3337_v33, %v1209_v7  ;;  %v1879_v51 = vsel %vm1623_vm13, %v1495_v9, %v1751_v21  ;;  %v1372_v41 = vmul.f32 %v3339_v34, %v1209_v7  ;;  %v4616_v59 = vld [vmem:[#allocation13_spill] sm:$0xff] }
 0x110   : > { %v1373_v15 = vmul.f32 %v3341_v35, %v1209_v7  ;;  %v1374_v57 = vmul.f32 %v3343_v36, %v1209_v7  ;;  %v1983_v62 = vpack.c.bf16 %v1879_v51, %v1875_v5  ;;  %v1877_v1 = vsel %vm1621_vm14, %v3857_v6, %v1749_v56  ;;  %3023 = vset.pattern.permute.xlu1 %v4593_v25 }
 0x111   : > { %v1881_v2 = vsel %vm1625_vm15, %v1497_v3, %v1753_v58  ;;  %v3903_v61 = vadd.f32 %v1371_v11, %v1079_v49  ;;  %v1500_v45 = vadd.f32 %v1372_v41, %v1080_v8  ;;  %v955_v9 = vmul.f32 %v3325_v26, %v3880_v22  ;;  %844 = vperm.xlu1 %3023, %v3068_v32   ;;  %v3069_v11 = vld [vmem:[%s3146_s7 + $0xd8] sm:$0xff] }
 0x112   : > { %v1985_v31 = vpack.c.bf16 %v1881_v2, %v1877_v1  ;;  %v3905_v53 = vadd.f32 %v1373_v15, %v1081_v63  ;;  %v1502_v17 = vadd.f32 %v1374_v57, %v1082_v20  ;;  %2363 = vmatmul.mubr.bf16.gmra.mxu0 %v1983_v62  ;;  %v956_v50 = vmul.f32 %v3327_v27, %v3880_v22  ;;  %v797_v13 = vpop.permute.xlu1 %796  ;;  %v1217_v57 = vpop.permute.xlu0 %1216 }
 0x113   : > { %v957_v6 = vmul.f32 %v3329_v28, %v3880_v22  ;;  %v958_v3 = vmul.f32 %v3331_v29, %v3880_v22  ;;  %v1375_v18 = vmul.f32 %v3337_v33, %v1213_v14  ;;  %v1376_v12 = vmul.f32 %v3339_v34, %v1213_v14 }
 0x114   : > { %2524 = vmatmul.mubr.bf16.gmra.mxu1 %v1985_v31  ;;  %v1377_v16 = vmul.f32 %v3341_v35, %v1213_v14  ;;  %v1378_v54 = vmul.f32 %v3343_v36, %v1213_v14  ;;  %v1083_v19 = vadd.f32 %v955_v9, %v4613_v47  ;;  %v1084_v48 = vadd.f32 %v956_v50, %v4614_v0 }
 0x115   : > { %v1085_v52 = vadd.f32 %v957_v6, %v4615_v30  ;;  %v1086_v4 = vadd.f32 %v958_v3, %v4616_v59  ;;  %v518_v22 = vmul.f32 %v3346_v37, %v337_v55  ;;  %v519_v49 = vmul.f32 %v3348_v38, %v337_v55  ;;  %848 = vperm.xlu1 %3023, %v3069_v11  }
 0x116   : > { %v520_v8 = vmul.f32 %v3350_v39, %v337_v55  ;;  %v521_v7 = vmul.f32 %v3352_v40, %v337_v55  ;;  %v1503_v14 = vadd.f32 %v1375_v18, %v1083_v19  ;;  %v1504_v63 = vadd.f32 %v1376_v12, %v1084_v48  ;;  %v801_v58 = vpop.permute.xlu1 %800 }
 0x117   : > { %v1505_v10 = vadd.f32 %v1377_v16, %v1085_v52  ;;  %v1506_v20 = vadd.f32 %v1378_v54, %v1086_v4  ;;  %v667_v21 = vadd.f32 %v3355_v42, %v518_v22  ;;  %v668_v5 = vadd.f32 %v3357_v43, %v519_v49 }
 0x118   : > { %v669_v56 = vadd.f32 %v3359_v44, %v520_v8  ;;  %v670_v32 = vadd.f32 %v3361_v46, %v521_v7  ;;  %vm1628_vm0 = vcmp.ge.f32.partialorder %v1500_v45, 0.0  ;;  %vm1632_vm1 = vcmp.ge.f32.partialorder %v1504_v63, 0.0 }
 0x119   : > { %v1756_v51 = vmul.f32 0.01, %v1500_v45  ;;  %v1760_v41 = vmul.f32 0.01, %v1504_v63  ;;  %vm1630_vm2 = vcmp.ge.f32.partialorder %v1502_v17, 0.0  ;;  %vm1634_vm3 = vcmp.ge.f32.partialorder %v1506_v20, 0.0  ;;  %3024 = vset.pattern.permute.xlu1 %v4590_v24 }
 0x11a   : > { %v1758_v55 = vmul.f32 0.01, %v1502_v17  ;;  %v1762_v15 = vmul.f32 0.01, %v1506_v20  ;;  %v959_v2 = vmul.f32 %v3325_v26, %v797_v13  ;;  %v960_v31 = vmul.f32 %v3327_v27, %v797_v13  ;;  %1268 = vperm.xlu1 %3024, %v3069_v11   ;;  %v3070_v11 = vld [vmem:[%s3146_s7 + $0xe0] sm:$0xff] }
 0x11b   : > { %v1884_v62 = vsel %vm1628_vm0, %v1500_v45, %v1756_v51  ;;  %v1888_v1 = vsel %vm1632_vm1, %v1504_v63, %v1760_v41  ;;  %v961_v3 = vmul.f32 %v3329_v28, %v797_v13  ;;  %v962_v12 = vmul.f32 %v3331_v29, %v797_v13 }
 0x11c   : > { %v1988_v9 = vpack.c.bf16 %v1888_v1, %v1884_v62  ;;  %v1886_v50 = vsel %vm1630_vm2, %v1502_v17, %v1758_v55  ;;  %v1890_v6 = vsel %vm1634_vm3, %v1506_v20, %v1762_v15  ;;  %v1087_v16 = vadd.f32 %v959_v2, %v667_v21  ;;  %v1225_v17 = vpop.permute.xlu0 %1224 }
 0x11d   : > { %v1990_v18 = vpack.c.bf16 %v1890_v6, %v1886_v50  ;;  %v1088_v54 = vadd.f32 %v960_v31, %v668_v5  ;;  %v1221_v47 = vpop.permute.xlu1 %1220  ;;  %v1089_v45 = vadd.f32 %v961_v3, %v669_v56  ;;  %vm1627_vm4 = vcmp.ge.f32.partialorder %v3903_v61, 0.0  ;;  %v4617_v31 = vld [vmem:[#allocation2_spill] sm:$0xff]  ;;  %v4618_v50 = vld [vmem:[#allocation8_spill] sm:$0xff] }
 0x11e   : > { %2370 = vmatprep.mubr.bf16.mxu0 %v1988_v9  ;;  %vm1631_vm5 = vcmp.ge.f32.partialorder %v1503_v14, 0.0  ;;  %v1755_v19 = vmul.f32 0.01, %v3903_v61  ;;  %v1090_v0 = vadd.f32 %v962_v12, %v670_v32  ;;  %v1759_v48 = vmul.f32 0.01, %v1503_v14  ;;  %3025 = vset.pattern.permute.xlu1 %v4592_v23  ;;  %v4619_v6 = vld [vmem:[#allocation10_spill] sm:$0xff] }
 0x11f   : > { %2531 = vmatprep.mubr.bf16.mxu1 %v1990_v18  ;;  %vm1629_vm6 = vcmp.ge.f32.partialorder %v3905_v53, 0.0  ;;  %vm1633_vm7 = vcmp.ge.f32.partialorder %v1505_v10, 0.0  ;;  %v1757_v30 = vmul.f32 0.01, %v3905_v53  ;;  %v1761_v52 = vmul.f32 0.01, %v1505_v10  ;;  %406 = vperm.xlu1 %3025, %v3070_v11  }
 0x120   : > { %v1883_v13 = vsel %vm1627_vm4, %v3903_v61, %v1755_v19  ;;  %v1379_v59 = vmul.f32 %v3337_v33, %v1217_v57  ;;  %v1887_v4 = vsel %vm1631_vm5, %v1503_v14, %v1759_v48  ;;  %v1380_v22 = vmul.f32 %v3339_v34, %v1217_v57  ;;  %v1233_v55 = vpop.permute.xlu0 %1232 }
 0x121   : > { %v1381_v49 = vmul.f32 %v3341_v35, %v1217_v57  ;;  %v1382_v8 = vmul.f32 %v3343_v36, %v1217_v57  ;;  %v1987_v7 = vpack.c.bf16 %v1887_v4, %v1883_v13  ;;  %v1885_v63 = vsel %vm1629_vm6, %v3905_v53, %v1757_v30 }
 0x122   : > { %v1889_v20 = vsel %vm1633_vm7, %v1505_v10, %v1761_v52  ;;  %v3948_v21 = vadd.f32 %v1379_v59, %v1087_v16  ;;  %v347_v61 = vpop.permute.xlu1 %346  ;;  %v1508_v56 = vadd.f32 %v1380_v22, %v1088_v54  ;;  %v963_v51 = vmul.f32 %v3325_v26, %v801_v58 }
 0x123   : > { %v1989_v5 = vpack.c.bf16 %v1889_v20, %v1885_v63  ;;  %v3951_v32 = vadd.f32 %v1381_v49, %v1089_v45  ;;  %v3953_v14 = vadd.f32 %v1382_v8, %v1090_v0  ;;  %2371 = vmatmul.mubr.bf16.gmra.mxu0 %v1987_v7  ;;  %v964_v41 = vmul.f32 %v3327_v27, %v801_v58 }
 0x124   : > { %v965_v53 = vmul.f32 %v3329_v28, %v801_v58  ;;  %v966_v10 = vmul.f32 %v3331_v29, %v801_v58  ;;  %v3961_v15 = vmul.f32 %v3337_v33, %v1225_v17  ;;  %v3964_v57 = vmul.f32 %v3339_v34, %v1225_v17  ;;  %3026 = vset.pattern.permute.xlu1 %v4593_v25  ;;  %v1241_v49 = vpop.permute.xlu0 %1240 }
 0x125   : > { %2532 = vmatmul.mubr.bf16.gmra.mxu1 %v1989_v5  ;;  %v3967_v62 = vmul.f32 %v3341_v35, %v1225_v17  ;;  %v3970_v1 = vmul.f32 %v3343_v36, %v1225_v17  ;;  %v1091_v2 = vadd.f32 %v963_v51, %v3701_v60  ;;  %v1092_v9 = vadd.f32 %v964_v41, %v4617_v31  ;;  %v3071_v5 = vld [vmem:[%s3146_s7 + $0xe8] sm:$0xff] }
 0x126   : > { %v1093_v58 = vadd.f32 %v965_v53, %v4618_v50  ;;  %v1094_v3 = vadd.f32 %v966_v10, %v4619_v6  ;;  %v1383_v18 = vmul.f32 %v3337_v33, %v1221_v47  ;;  %v1384_v12 = vmul.f32 %v3339_v34, %v1221_v47  ;;  %852 = vperm.xlu1 %3026, %v3070_v11  }
 0x127   : > { %v1385_v16 = vmul.f32 %v3341_v35, %v1221_v47  ;;  %v1386_v54 = vmul.f32 %v3343_v36, %v1221_v47  ;;  %v805_v45 = vpop.permute.xlu1 %804  ;;  %v3982_v60 = vmul.f32 %v3337_v33, %v1233_v55  ;;  %v3985_v19 = vmul.f32 %v3339_v34, %v1233_v55 }
 0x128   : > { %v3988_v17 = vmul.f32 %v3341_v35, %v1233_v55  ;;  %v3991_v0 = vmul.f32 %v3343_v36, %v1233_v55  ;;  %v1511_v48 = vadd.f32 %v1383_v18, %v1091_v2  ;;  %v1512_v13 = vadd.f32 %v1384_v12, %v1092_v9 }
 0x129   : > { %v3993_v30 = vadd.f32 %v1385_v16, %v1093_v58  ;;  %v1514_v47 = vadd.f32 %v1386_v54, %v1094_v3  ;;  %v526_v52 = vmul.f32 %v3346_v37, %v347_v61  ;;  %v527_v59 = vmul.f32 %v3348_v38, %v347_v61 }
 0x12a   : > { %v528_v4 = vmul.f32 %v3350_v39, %v347_v61  ;;  %v529_v22 = vmul.f32 %v3352_v40, %v347_v61  ;;  %v4000_v8 = vmul.f32 %v3337_v33, %v1241_v49  ;;  %v4003_v7 = vmul.f32 %v3339_v34, %v1241_v49  ;;  %856 = vperm.xlu1 %3026, %v3071_v5  }
 0x12b   : > { %v4006_v63 = vmul.f32 %v3341_v35, %v1241_v49  ;;  %v4009_v20 = vmul.f32 %v3343_v36, %v1241_v49  ;;  %v675_v11 = vadd.f32 %v3355_v42, %v526_v52  ;;  %v676_v51 = vadd.f32 %v3357_v43, %v527_v59  ;;  %v809_v53 = vpop.permute.xlu1 %808 }
 0x12c   : > { %v677_v61 = vadd.f32 %v3359_v44, %v528_v4  ;;  %v678_v41 = vadd.f32 %v3361_v46, %v529_v22  ;;  %vm1636_vm8 = vcmp.ge.f32.partialorder %v1508_v56, 0.0  ;;  %vm1640_vm9 = vcmp.ge.f32.partialorder %v1512_v13, 0.0 }
 0x12d   : > { %v1764_v10 = vmul.f32 0.01, %v1508_v56  ;;  %v1768_v55 = vmul.f32 0.01, %v1512_v13  ;;  %vm1638_vm10 = vcmp.ge.f32.partialorder %v3953_v14, 0.0  ;;  %vm1642_vm11 = vcmp.ge.f32.partialorder %v1514_v47, 0.0 }
 0x12e   : > { %v1766_v2 = vmul.f32 0.01, %v3953_v14  ;;  %v1770_v31 = vmul.f32 0.01, %v1514_v47  ;;  %v967_v58 = vmul.f32 %v3325_v26, %v805_v45  ;;  %v968_v6 = vmul.f32 %v3327_v27, %v805_v45  ;;  %3028 = vset.pattern.permute.xlu1 %v4590_v24 }
 0x12f   : > { %v1892_v9 = vsel %vm1636_vm8, %v1508_v56, %v1764_v10  ;;  %v1896_v50 = vsel %vm1640_vm9, %v1512_v13, %v1768_v55  ;;  %v969_v16 = vmul.f32 %v3329_v28, %v805_v45  ;;  %1276 = vperm.xlu1 %3028, %v3071_v5   ;;  %v970_v52 = vmul.f32 %v3331_v29, %v805_v45  ;;  %v352_v13 = vpop.permute.xlu0 %351 }
 0x130   : > { %v1992_v3 = vpack.c.bf16 %v1896_v50, %v1892_v9  ;;  %v1894_v18 = vsel %vm1638_vm10, %v3953_v14, %v1766_v2  ;;  %v1898_v12 = vsel %vm1642_vm11, %v1514_v47, %v1770_v31  ;;  %v4024_v59 = vadd.f32 %v967_v58, %v675_v11  ;;  %v3072_v50 = vld [vmem:[%s3146_s7 + $0xf0] sm:$0xff] }
 0x131   : > { %v1994_v54 = vpack.c.bf16 %v1898_v12, %v1894_v18  ;;  %v1096_v56 = vadd.f32 %v968_v6, %v676_v51  ;;  %v4026_v4 = vadd.f32 %v969_v16, %v677_v61  ;;  %vm1635_vm12 = vcmp.ge.f32.partialorder %v3948_v21, 0.0  ;;  %v1229_v14 = vpop.permute.xlu1 %1228 }
 0x132   : > { %2378 = vmatprep.mubr.bf16.mxu0 %v1992_v3  ;;  %vm1639_vm13 = vcmp.ge.f32.partialorder %v1511_v48, 0.0  ;;  %v1763_v22 = vmul.f32 0.01, %v3948_v21  ;;  %v1098_v47 = vadd.f32 %v970_v52, %v678_v41  ;;  %v1767_v49 = vmul.f32 0.01, %v1511_v48 }
 0x133   : > { %2539 = vmatprep.mubr.bf16.mxu1 %v1994_v54  ;;  %vm1637_vm14 = vcmp.ge.f32.partialorder %v3951_v32, 0.0  ;;  %vm1641_vm15 = vcmp.ge.f32.partialorder %v3993_v30, 0.0  ;;  %v1765_v5 = vmul.f32 0.01, %v3951_v32  ;;  %v1769_v11 = vmul.f32 0.01, %v3993_v30  ;;  %3029 = vset.pattern.permute.xlu1 %v4592_v23 }
 0x134   : > { %v1891_v45 = vsel %vm1635_vm12, %v3948_v21, %v1763_v22  ;;  %v530_v51 = vmul.f32 %v3346_v37, %v352_v13  ;;  %v1895_v61 = vsel %vm1639_vm13, %v1511_v48, %v1767_v49  ;;  %v531_v10 = vmul.f32 %v3348_v38, %v352_v13  ;;  %416 = vperm.xlu1 %3029, %v3072_v50  }
 0x135   : > { %v532_v55 = vmul.f32 %v3350_v39, %v352_v13  ;;  %v533_v41 = vmul.f32 %v3352_v40, %v352_v13  ;;  %v1991_v2 = vpack.c.bf16 %v1895_v61, %v1891_v45  ;;  %v1893_v31 = vsel %vm1637_vm14, %v3951_v32, %v1765_v5 }
 0x136   : > { %v1897_v21 = vsel %vm1641_vm15, %v3993_v30, %v1769_v11  ;;  %v679_v9 = vadd.f32 %v3355_v42, %v530_v51  ;;  %v680_v48 = vadd.f32 %v3357_v43, %v531_v10  ;;  %v357_v18 = vpop.permute.xlu1 %356  ;;  %v971_v23 = vmul.f32 %v3325_v26, %v809_v53 }
 0x137   : > { %v1993_v58 = vpack.c.bf16 %v1897_v21, %v1893_v31  ;;  %v681_v6 = vadd.f32 %v3359_v44, %v532_v55  ;;  %v682_v3 = vadd.f32 %v3361_v46, %v533_v41  ;;  %2379 = vmatmul.mubr.bf16.gmra.mxu0 %v1991_v2  ;;  %v972_v12 = vmul.f32 %v3327_v27, %v809_v53 }
 0x138   : > { %v973_v32 = vmul.f32 %v3329_v28, %v809_v53  ;;  %v974_v30 = vmul.f32 %v3331_v29, %v809_v53  ;;  %v1391_v16 = vmul.f32 %v3337_v33, %v1229_v14  ;;  %v1392_v54 = vmul.f32 %v3339_v34, %v1229_v14  ;;  %3030 = vset.pattern.permute.xlu1 %v4593_v25 }
 0x139   : > { %2540 = vmatmul.mubr.bf16.gmra.mxu1 %v1993_v58  ;;  %v1393_v52 = vmul.f32 %v3341_v35, %v1229_v14  ;;  %v1394_v13 = vmul.f32 %v3343_v36, %v1229_v14  ;;  %v1099_v22 = vadd.f32 %v971_v23, %v679_v9  ;;  %v1100_v49 = vadd.f32 %v972_v12, %v680_v48 }
 0x13a   : > { %v1101_v45 = vadd.f32 %v973_v32, %v681_v6  ;;  %v1102_v5 = vadd.f32 %v974_v30, %v682_v3  ;;  %860 = vperm.xlu1 %3030, %v3072_v50   ;;  %v534_v11 = vmul.f32 %v3346_v37, %v357_v18  ;;  %v535_v53 = vmul.f32 %v3348_v38, %v357_v18  ;;  %v3073_v6 = vld [vmem:[%s3146_s7 + $0xf8] sm:$0xff] }
 0x13b   : > { %v536_v51 = vmul.f32 %v3350_v39, %v357_v18  ;;  %v537_v61 = vmul.f32 %v3352_v40, %v357_v18  ;;  %v1519_v10 = vadd.f32 %v1391_v16, %v1099_v22  ;;  %v1520_v55 = vadd.f32 %v1392_v54, %v1100_v49 }
 0x13c   : > { %v1521_v41 = vadd.f32 %v1393_v52, %v1101_v45  ;;  %v1522_v14 = vadd.f32 %v1394_v13, %v1102_v5  ;;  %v683_v2 = vadd.f32 %v3355_v42, %v534_v11  ;;  %v684_v31 = vadd.f32 %v3357_v43, %v535_v53  ;;  %v813_v9 = vpop.permute.xlu1 %812  ;;  %v362_v11 = vpop.permute.xlu0 %361 }
 0x13d   : > { %v685_v25 = vadd.f32 %v3359_v44, %v536_v51  ;;  %v686_v21 = vadd.f32 %v3361_v46, %v537_v61  ;;  %v1516_v50 = vadd.f32 %v3964_v57, %v1096_v56  ;;  %vm1648_vm0 = vcmp.ge.f32.partialorder %v1520_v55, 0.0 }
 0x13e   : > { %v1776_v58 = vmul.f32 0.01, %v1520_v55  ;;  %v1518_v48 = vadd.f32 %v3970_v1, %v1098_v47  ;;  %864 = vperm.xlu1 %3030, %v3073_v6   ;;  %vm1650_vm1 = vcmp.ge.f32.partialorder %v1522_v14, 0.0  ;;  %v1778_v3 = vmul.f32 0.01, %v1522_v14 }
 0x13f   : > { %v975_v18 = vmul.f32 %v3325_v26, %v813_v9  ;;  %v976_v23 = vmul.f32 %v3327_v27, %v813_v9  ;;  %vm1644_vm2 = vcmp.ge.f32.partialorder %v1516_v50, 0.0  ;;  %v1772_v12 = vmul.f32 0.01, %v1516_v50 }
 0x140   : > { %v1904_v32 = vsel %vm1648_vm0, %v1520_v55, %v1776_v58  ;;  %vm1646_vm3 = vcmp.ge.f32.partialorder %v1518_v48, 0.0  ;;  %v1774_v30 = vmul.f32 0.01, %v1518_v48  ;;  %v1906_v16 = vsel %vm1650_vm1, %v1522_v14, %v1778_v3  ;;  %v817_v54 = vpop.permute.xlu1 %816 }
 0x141   : > { %v977_v57 = vmul.f32 %v3329_v28, %v813_v9  ;;  %v978_v56 = vmul.f32 %v3331_v29, %v813_v9  ;;  %v1900_v1 = vsel %vm1644_vm2, %v1516_v50, %v1772_v12  ;;  %v4071_v47 = vadd.f32 %v975_v18, %v683_v2 }
 0x142   : > { %v1104_v52 = vadd.f32 %v976_v23, %v684_v31  ;;  %v1515_v13 = vadd.f32 %v3961_v15, %v4024_v59  ;;  %3032 = vset.pattern.permute.xlu1 %v4590_v24  ;;  %v1996_v22 = vpack.c.bf16 %v1904_v32, %v1900_v1  ;;  %v1902_v49 = vsel %vm1646_vm3, %v1518_v48, %v1774_v30 }
 0x143   : > { %v4076_v45 = vadd.f32 %v977_v57, %v685_v25  ;;  %v1106_v5 = vadd.f32 %v978_v56, %v686_v21  ;;  %1284 = vperm.xlu1 %3032, %v3073_v6   ;;  %v1998_v53 = vpack.c.bf16 %v1906_v16, %v1902_v49  ;;  %vm1647_vm5 = vcmp.ge.f32.partialorder %v1519_v10, 0.0 }
 0x144   : > { %vm1643_vm4 = vcmp.ge.f32.partialorder %v1515_v13, 0.0  ;;  %v1771_v51 = vmul.f32 0.01, %v1515_v13  ;;  %2386 = vmatprep.mubr.bf16.mxu0 %v1996_v22  ;;  %v1775_v61 = vmul.f32 0.01, %v1519_v10  ;;  %v1517_v55 = vadd.f32 %v3967_v62, %v4026_v4 }
 0x145   : > { %vm1649_vm6 = vcmp.ge.f32.partialorder %v1521_v41, 0.0  ;;  %v1777_v15 = vmul.f32 0.01, %v1521_v41  ;;  %2547 = vmatprep.mubr.bf16.mxu1 %v1998_v53  ;;  %v538_v59 = vmul.f32 %v3346_v37, %v362_v11  ;;  %v539_v14 = vmul.f32 %v3348_v38, %v362_v11 }
 0x146   : > { %v1899_v24 = vsel %vm1643_vm4, %v1515_v13, %v1771_v51  ;;  %v540_v2 = vmul.f32 %v3350_v39, %v362_v11  ;;  %v1903_v31 = vsel %vm1647_vm5, %v1519_v10, %v1775_v61  ;;  %vm1645_vm7 = vcmp.ge.f32.partialorder %v1517_v55, 0.0  ;;  %v1237_v9 = vpop.permute.xlu1 %1236 }
 0x147   : > { %v1773_v25 = vmul.f32 0.01, %v1517_v55  ;;  %v1905_v21 = vsel %vm1649_vm6, %v1521_v41, %v1777_v15  ;;  %v1995_v50 = vpack.c.bf16 %v1903_v31, %v1899_v24  ;;  %v541_v58 = vmul.f32 %v3352_v40, %v362_v11 }
 0x148   : > { %v687_v62 = vadd.f32 %v3355_v42, %v538_v59  ;;  %v688_v4 = vadd.f32 %v3357_v43, %v539_v14  ;;  %v689_v6 = vadd.f32 %v3359_v44, %v540_v2  ;;  %v979_v3 = vmul.f32 %v3325_v26, %v817_v54 }
 0x149   : > { %v1901_v48 = vsel %vm1645_vm7, %v1517_v55, %v1773_v25  ;;  %v980_v18 = vmul.f32 %v3327_v27, %v817_v54  ;;  %2387 = vmatmul.mubr.bf16.gmra.mxu0 %v1995_v50  ;;  %v690_v23 = vadd.f32 %v3361_v46, %v541_v58  ;;  %v981_v41 = vmul.f32 %v3329_v28, %v817_v54 }
 0x14a   : > { %v1997_v10 = vpack.c.bf16 %v1905_v21, %v1901_v48  ;;  %v982_v12 = vmul.f32 %v3331_v29, %v817_v54  ;;  %v1107_v32 = vadd.f32 %v979_v3, %v687_v62  ;;  %v1399_v16 = vmul.f32 %v3337_v33, %v1237_v9 }
 0x14b   : > { %v1108_v30 = vadd.f32 %v980_v18, %v688_v4  ;;  %v1400_v57 = vmul.f32 %v3339_v34, %v1237_v9  ;;  %v1109_v56 = vadd.f32 %v981_v41, %v689_v6  ;;  %v1401_v13 = vmul.f32 %v3341_v35, %v1237_v9  ;;  %v367_v49 = vpop.permute.xlu1 %366  ;;  %v372_v41 = vpop.permute.xlu0 %371 }
 0x14c   : > { %2548 = vmatmul.mubr.bf16.gmra.mxu1 %v1997_v10  ;;  %v1110_v1 = vadd.f32 %v982_v12, %v690_v23  ;;  %v1402_v22 = vmul.f32 %v3343_v36, %v1237_v9  ;;  %v1527_v11 = vadd.f32 %v1399_v16, %v1107_v32  ;;  %v542_v51 = vmul.f32 %v3346_v37, %v367_v49 }
 0x14d   : > { %v1528_v53 = vadd.f32 %v1400_v57, %v1108_v30  ;;  %v543_v54 = vmul.f32 %v3348_v38, %v367_v49  ;;  %v1529_v61 = vadd.f32 %v1401_v13, %v1109_v56  ;;  %v544_v15 = vmul.f32 %v3350_v39, %v367_v49 }
 0x14e   : > { %v1530_v55 = vadd.f32 %v1402_v22, %v1110_v1  ;;  %v545_v24 = vmul.f32 %v3352_v40, %v367_v49  ;;  %v691_v59 = vadd.f32 %v3355_v42, %v542_v51  ;;  %v1524_v2 = vadd.f32 %v3985_v19, %v1104_v52 }
 0x14f   : > { %v692_v14 = vadd.f32 %v3357_v43, %v543_v54  ;;  %vm1656_vm8 = vcmp.ge.f32.partialorder %v1528_v53, 0.0  ;;  %v693_v31 = vadd.f32 %v3359_v44, %v544_v15  ;;  %v1784_v21 = vmul.f32 0.01, %v1528_v53 }
 0x150   : > { %v694_v25 = vadd.f32 %v3361_v46, %v545_v24  ;;  %v1526_v9 = vadd.f32 %v3991_v0, %v1106_v5  ;;  %vm1652_vm9 = vcmp.ge.f32.partialorder %v1524_v2, 0.0  ;;  %v1780_v50 = vmul.f32 0.01, %v1524_v2  ;;  %v821_v62 = vpop.permute.xlu1 %820 }
 0x151   : > { %vm1658_vm10 = vcmp.ge.f32.partialorder %v1530_v55, 0.0  ;;  %v1786_v58 = vmul.f32 0.01, %v1530_v55  ;;  %v1912_v4 = vsel %vm1656_vm8, %v1528_v53, %v1784_v21  ;;  %v983_v6 = vmul.f32 %v3325_v26, %v821_v62 }
 0x152   : > { %vm1654_vm11 = vcmp.ge.f32.partialorder %v1526_v9, 0.0  ;;  %v1782_v48 = vmul.f32 0.01, %v1526_v9  ;;  %v1908_v3 = vsel %vm1652_vm9, %v1524_v2, %v1780_v50  ;;  %v984_v52 = vmul.f32 %v3327_v27, %v821_v62 }
 0x153   : > { %v1914_v19 = vsel %vm1658_vm10, %v1530_v55, %v1786_v58  ;;  %v985_v18 = vmul.f32 %v3329_v28, %v821_v62  ;;  %v2000_v10 = vpack.c.bf16 %v1912_v4, %v1908_v3  ;;  %v986_v0 = vmul.f32 %v3331_v29, %v821_v62 }
 0x154   : > { %v1910_v23 = vsel %vm1654_vm11, %v1526_v9, %v1782_v48  ;;  %v4110_v5 = vadd.f32 %v983_v6, %v691_v59  ;;  %v4112_v32 = vadd.f32 %v984_v52, %v692_v14  ;;  %v1523_v16 = vadd.f32 %v3982_v60, %v4071_v47  ;;  %v825_v13 = vpop.permute.xlu1 %824  ;;  %v382_v60 = vpop.permute.xlu0 %381 }
 0x155   : > { %v2002_v12 = vpack.c.bf16 %v1914_v19, %v1910_v23  ;;  %v4114_v30 = vadd.f32 %v985_v18, %v693_v31  ;;  %2394 = vmatprep.mubr.bf16.mxu0 %v2000_v10  ;;  %v4118_v57 = vadd.f32 %v986_v0, %v694_v25  ;;  %vm1655_vm12 = vcmp.ge.f32.partialorder %v1527_v11, 0.0 }
 0x156   : > { %v1783_v56 = vmul.f32 0.01, %v1527_v11  ;;  %v1525_v1 = vadd.f32 %v3988_v17, %v4076_v45  ;;  %vm1651_vm13 = vcmp.ge.f32.partialorder %v1523_v16, 0.0  ;;  %v1779_v22 = vmul.f32 0.01, %v1523_v16 }
 0x157   : > { %2555 = vmatprep.mubr.bf16.mxu1 %v2002_v12  ;;  %vm1657_vm14 = vcmp.ge.f32.partialorder %v1529_v61, 0.0  ;;  %v1785_v49 = vmul.f32 0.01, %v1529_v61  ;;  %v546_v54 = vmul.f32 %v3346_v37, %v372_v41  ;;  %v547_v15 = vmul.f32 %v3348_v38, %v372_v41 }
 0x158   : > { %v1911_v53 = vsel %vm1655_vm12, %v1527_v11, %v1783_v56  ;;  %vm1653_vm15 = vcmp.ge.f32.partialorder %v1525_v1, 0.0  ;;  %v1781_v51 = vmul.f32 0.01, %v1525_v1  ;;  %v1907_v47 = vsel %vm1651_vm13, %v1523_v16, %v1779_v22  ;;  %v392_v10 = vpop.permute.xlu0 %391 }
 0x159   : > { %v1913_v55 = vsel %vm1657_vm14, %v1529_v61, %v1785_v49  ;;  %v548_v24 = vmul.f32 %v3350_v39, %v372_v41  ;;  %v1999_v59 = vpack.c.bf16 %v1911_v53, %v1907_v47  ;;  %v549_v45 = vmul.f32 %v3352_v40, %v372_v41  ;;  %v1245_v58 = vpop.permute.xlu1 %1244 }
 0x15a   : > { %v1909_v17 = vsel %vm1653_vm15, %v1525_v1, %v1781_v51  ;;  %v695_v14 = vadd.f32 %v3355_v42, %v546_v54  ;;  %v696_v11 = vadd.f32 %v3357_v43, %v547_v15  ;;  %v987_v25 = vmul.f32 %v3325_v26, %v825_v13 }
 0x15b   : > { %v2001_v2 = vpack.c.bf16 %v1913_v55, %v1909_v17  ;;  %v697_v31 = vadd.f32 %v3359_v44, %v548_v24  ;;  %2395 = vmatmul.mubr.bf16.gmra.mxu0 %v1999_v59  ;;  %v698_v61 = vadd.f32 %v3361_v46, %v549_v45  ;;  %v988_v21 = vmul.f32 %v3327_v27, %v825_v13 }
 0x15c   : > { %v989_v9 = vmul.f32 %v3329_v28, %v825_v13  ;;  %v990_v50 = vmul.f32 %v3331_v29, %v825_v13  ;;  %v1115_v62 = vadd.f32 %v987_v25, %v695_v14  ;;  %v554_v4 = vmul.f32 %v3346_v37, %v382_v60  ;;  %v402_v25 = vpop.permute.xlu0 %401 }
 0x15d   : > { %2556 = vmatmul.mubr.bf16.gmra.mxu1 %v2001_v2  ;;  %v555_v48 = vmul.f32 %v3348_v38, %v382_v60  ;;  %v556_v6 = vmul.f32 %v3350_v39, %v382_v60  ;;  %v1116_v3 = vadd.f32 %v988_v21, %v696_v11  ;;  %v557_v18 = vmul.f32 %v3352_v40, %v382_v60 }
 0x15e   : > { %v1117_v19 = vadd.f32 %v989_v9, %v697_v31  ;;  %v1118_v52 = vadd.f32 %v990_v50, %v698_v61  ;;  %v4139_v23 = vadd.f32 %v3355_v42, %v554_v4  ;;  %v1407_v12 = vmul.f32 %v3337_v33, %v1245_v58  ;;  %v377_v54 = vpop.permute.xlu1 %376 }
 0x15f   : > { %v4142_v0 = vadd.f32 %v3357_v43, %v555_v48  ;;  %v4145_v41 = vadd.f32 %v3359_v44, %v556_v6  ;;  %v4149_v16 = vadd.f32 %v3361_v46, %v557_v18  ;;  %v1408_v56 = vmul.f32 %v3339_v34, %v1245_v58 }
 0x160   : > { %v1409_v1 = vmul.f32 %v3341_v35, %v1245_v58  ;;  %v1410_v13 = vmul.f32 %v3343_v36, %v1245_v58  ;;  %v4154_v22 = vadd.f32 %v1407_v12, %v1115_v62  ;;  %v562_v49 = vmul.f32 %v3346_v37, %v392_v10 }
 0x161   : > { %v563_v53 = vmul.f32 %v3348_v38, %v392_v10  ;;  %v564_v51 = vmul.f32 %v3350_v39, %v392_v10  ;;  %v1536_v60 = vadd.f32 %v1408_v56, %v1116_v3  ;;  %v565_v15 = vmul.f32 %v3352_v40, %v392_v10 }
 0x162   : > { %v4159_v47 = vadd.f32 %v1409_v1, %v1117_v19  ;;  %v1538_v55 = vadd.f32 %v1410_v13, %v1118_v52  ;;  %v4163_v24 = vadd.f32 %v3355_v42, %v562_v49  ;;  %v550_v45 = vmul.f32 %v3346_v37, %v377_v54 }
 0x163   : > { %v4166_v59 = vadd.f32 %v3357_v43, %v563_v53  ;;  %v4169_v17 = vadd.f32 %v3359_v44, %v564_v51  ;;  %v4173_v14 = vadd.f32 %v3361_v46, %v565_v15  ;;  %v551_v2 = vmul.f32 %v3348_v38, %v377_v54  ;;  %v829_v6 = vpop.permute.xlu1 %828 }
 0x164   : > { %v552_v11 = vmul.f32 %v3350_v39, %v377_v54  ;;  %v553_v31 = vmul.f32 %v3352_v40, %v377_v54  ;;  %v699_v61 = vadd.f32 %v3355_v42, %v550_v45  ;;  %v570_v21 = vmul.f32 %v3346_v37, %v402_v25 }
 0x165   : > { %v571_v9 = vmul.f32 %v3348_v38, %v402_v25  ;;  %v572_v50 = vmul.f32 %v3350_v39, %v402_v25  ;;  %v700_v58 = vadd.f32 %v3357_v43, %v551_v2  ;;  %v573_v48 = vmul.f32 %v3352_v40, %v402_v25 }
 0x166   : > { %v701_v62 = vadd.f32 %v3359_v44, %v552_v11  ;;  %v702_v4 = vadd.f32 %v3361_v46, %v553_v31  ;;  %v4187_v3 = vadd.f32 %v3355_v42, %v570_v21  ;;  %v1532_v18 = vadd.f32 %v4003_v7, %v4112_v32 }
 0x167   : > { %v4190_v19 = vadd.f32 %v3357_v43, %v571_v9  ;;  %v4193_v52 = vadd.f32 %v3359_v44, %v572_v50  ;;  %v4198_v10 = vadd.f32 %v3361_v46, %v573_v48  ;;  %vm1664_vm0 = vcmp.ge.f32.partialorder %v1536_v60, 0.0  ;;  %v1249_v9 = vpop.permute.xlu0 %1248 }
 0x168   : > { %v1792_v12 = vmul.f32 0.01, %v1536_v60  ;;  %v1534_v56 = vadd.f32 %v4009_v20, %v4118_v57  ;;  %vm1660_vm1 = vcmp.ge.f32.partialorder %v1532_v18, 0.0  ;;  %v1788_v1 = vmul.f32 0.01, %v1532_v18 }
 0x169   : > { %vm1666_vm2 = vcmp.ge.f32.partialorder %v1538_v55, 0.0  ;;  %v1794_v13 = vmul.f32 0.01, %v1538_v55  ;;  %v991_v51 = vmul.f32 %v3325_v26, %v829_v6  ;;  %v833_v54 = vpop.permute.xlu1 %832  ;;  %v992_v32 = vmul.f32 %v3327_v27, %v829_v6 }
 0x16a   : > { %v1920_v49 = vsel %vm1664_vm0, %v1536_v60, %v1792_v12  ;;  %vm1662_vm3 = vcmp.ge.f32.partialorder %v1534_v56, 0.0  ;;  %v1790_v53 = vmul.f32 0.01, %v1534_v56  ;;  %v1916_v15 = vsel %vm1660_vm1, %v1532_v18, %v1788_v1 }
 0x16b   : > { %v1922_v7 = vsel %vm1666_vm2, %v1538_v55, %v1794_v13  ;;  %v993_v45 = vmul.f32 %v3329_v28, %v829_v6  ;;  %v2004_v2 = vpack.c.bf16 %v1920_v49, %v1916_v15  ;;  %v994_v20 = vmul.f32 %v3331_v29, %v829_v6 }
 0x16c   : > { %v1918_v11 = vsel %vm1662_vm3, %v1534_v56, %v1790_v53  ;;  %v1119_v57 = vadd.f32 %v991_v51, %v699_v61  ;;  %v1120_v25 = vadd.f32 %v992_v32, %v700_v58  ;;  %v1531_v60 = vadd.f32 %v4000_v8, %v4110_v5 }
 0x16d   : > { %v2006_v31 = vpack.c.bf16 %v1922_v7, %v1918_v11  ;;  %v1121_v21 = vadd.f32 %v993_v45, %v701_v62  ;;  %2402 = vmatprep.mubr.bf16.mxu0 %v2004_v2  ;;  %v1122_v50 = vadd.f32 %v994_v20, %v702_v4  ;;  %vm1663_vm4 = vcmp.ge.f32.partialorder %v4154_v22, 0.0 }
 0x16e   : > { %v1791_v55 = vmul.f32 0.01, %v4154_v22  ;;  %v1533_v48 = vadd.f32 %v4006_v63, %v4114_v30  ;;  %vm1659_vm5 = vcmp.ge.f32.partialorder %v1531_v60, 0.0  ;;  %v1787_v6 = vmul.f32 0.01, %v1531_v60 }
 0x16f   : > { %2563 = vmatprep.mubr.bf16.mxu1 %v2006_v31  ;;  %vm1665_vm6 = vcmp.ge.f32.partialorder %v4159_v47, 0.0  ;;  %v1793_v61 = vmul.f32 0.01, %v4159_v47  ;;  %v1253_v58 = vpop.permute.xlu1 %1252  ;;  %v1411_v62 = vmul.f32 %v3337_v33, %v1249_v9  ;;  %v1412_v12 = vmul.f32 %v3339_v34, %v1249_v9 }
 0x170   : > { %v1919_v8 = vsel %vm1663_vm4, %v4154_v22, %v1791_v55  ;;  %vm1661_vm7 = vcmp.ge.f32.partialorder %v1533_v48, 0.0  ;;  %v1789_v5 = vmul.f32 0.01, %v1533_v48  ;;  %v1915_v4 = vsel %vm1659_vm5, %v1531_v60, %v1787_v6 }
 0x171   : > { %v1921_v18 = vsel %vm1665_vm6, %v4159_v47, %v1793_v61  ;;  %v1413_v63 = vmul.f32 %v3341_v35, %v1249_v9  ;;  %v2003_v30 = vpack.c.bf16 %v1919_v8, %v1915_v4  ;;  %v1414_v1 = vmul.f32 %v3343_v36, %v1249_v9 }
 0x172   : > { %v1917_v56 = vsel %vm1661_vm7, %v1533_v48, %v1789_v5  ;;  %v4220_v13 = vadd.f32 %v1411_v62, %v1119_v57  ;;  %v1540_v53 = vadd.f32 %v1412_v12, %v1120_v25  ;;  %v995_v51 = vmul.f32 %v3325_v26, %v833_v54 }
 0x173   : > { %v2005_v49 = vpack.c.bf16 %v1921_v18, %v1917_v56  ;;  %v4222_v22 = vadd.f32 %v1413_v63, %v1121_v21  ;;  %2403 = vmatmul.mubr.bf16.gmra.mxu0 %v2003_v30  ;;  %v1542_v15 = vadd.f32 %v1414_v1, %v1122_v50  ;;  %v996_v47 = vmul.f32 %v3327_v27, %v833_v54 }
 0x174   : > { %v997_v7 = vmul.f32 %v3329_v28, %v833_v54  ;;  %v998_v32 = vmul.f32 %v3331_v29, %v833_v54  ;;  %v387_v45 = vpop.permute.xlu1 %386  ;;  %v1123_v2 = vadd.f32 %v995_v51, %v4139_v23  ;;  %v1415_v11 = vmul.f32 %v3337_v33, %v1253_v58 }
 0x175   : > { %2564 = vmatmul.mubr.bf16.gmra.mxu1 %v2005_v49  ;;  %v1416_v20 = vmul.f32 %v3339_v34, %v1253_v58  ;;  %v1417_v57 = vmul.f32 %v3341_v35, %v1253_v58  ;;  %v1124_v31 = vadd.f32 %v996_v47, %v4142_v0  ;;  %v1418_v60 = vmul.f32 %v3343_v36, %v1253_v58  ;;  %v2760_v9 = vpop.f32.mrf.mxu0 }
 0x176   : > { %v1125_v25 = vadd.f32 %v997_v7, %v4145_v41  ;;  %v1126_v21 = vadd.f32 %v998_v32, %v4149_v16  ;;  %v1543_v54 = vadd.f32 %v1415_v11, %v1123_v2  ;;  %v558_v50 = vmul.f32 %v3346_v37, %v387_v45  ;;  %v4245_v41 = vld [vmem:[%s4565_s4] ss:$0 sm:$0xff] }
 0x177   : > { %v559_v23 = vmul.f32 %v3348_v38, %v387_v45  ;;  %v560_v55 = vmul.f32 %v3350_v39, %v387_v45  ;;  %v1544_v48 = vadd.f32 %v1416_v20, %v1124_v31  ;;  %v561_v0 = vmul.f32 %v3352_v40, %v387_v45  ;;  %v2761_v16 = vpop.f32.mrf.mxu0 }
 0x178   : > { %v4239_v6 = vadd.f32 %v1417_v57, %v1125_v25  ;;  %v1546_v61 = vadd.f32 %v1418_v60, %v1126_v21  ;;  %v707_v58 = vadd.f32 %v3355_v42, %v558_v50  ;;  %v2872_v62 = vpop.f32.mrf.mxu1  ;;  %v2762_v4 = vadd.f32 %v2761_v16, %v2760_v9  ;;  %v1257_v21 = vpop.permute.xlu0 %1256 }
 0x179   : > { %v708_v8 = vadd.f32 %v3357_v43, %v559_v23  ;;  %v709_v5 = vadd.f32 %v3359_v44, %v560_v55  ;;  %v837_v18 = vpop.permute.xlu1 %836  ;;  %v710_v12 = vadd.f32 %v3361_v46, %v561_v0  ;;  %vm1668_vm8 = vcmp.ge.f32.partialorder %v1540_v53, 0.0  ;;  %v2763_v57 = vpop.f32.mrf.mxu0 }
 0x17a   : > { %vm1672_vm9 = vcmp.ge.f32.partialorder %v1544_v48, 0.0  ;;  %v1796_v63 = vmul.f32 0.01, %v1540_v53  ;;  %v2325_v30 = vadd.f32 %v2762_v4, %v4245_v41  ;;  %v2873_v56 = vpop.f32.mrf.mxu1  ;;  %v1800_v1 = vmul.f32 0.01, %v1544_v48 }
 0x17b   : > { %vm1670_vm10 = vcmp.ge.f32.partialorder %v1542_v15, 0.0  ;;  %vm1674_vm11 = vcmp.ge.f32.partialorder %v1546_v61, 0.0  ;;  %v2874_v49 = vadd.f32 %v2873_v56, %v2872_v62  ;;  %v1798_v47 = vmul.f32 0.01, %v1542_v15 }
 0x17c   : > { %v1924_v51 = vsel %vm1668_vm8, %v1540_v53, %v1796_v63  ;;  %v1802_v7 = vmul.f32 0.01, %v1546_v61  ;;  %v1928_v32 = vsel %vm1672_vm9, %v1544_v48, %v1800_v1  ;;  %v999_v45 = vmul.f32 %v3325_v26, %v837_v18  ;;  %v2875_v60 = vpop.f32.mrf.mxu1 }
 0x17d   : > { %v1000_v2 = vmul.f32 %v3327_v27, %v837_v18  ;;  %v1001_v11 = vmul.f32 %v3329_v28, %v837_v18  ;;  %v2486_v20 = vadd.f32 %v2874_v49, %v2325_v30  ;;  %v2008_v31 = vpack.c.bf16 %v1928_v32, %v1924_v51  ;;  %v841_v48 = vpop.permute.xlu1 %840  ;;  %v2764_v30 = vpop.f32.mrf.mxu0 }
 0x17e   : > { %v1926_v53 = vsel %vm1670_vm10, %v1542_v15, %v1798_v47  ;;  %v1930_v25 = vsel %vm1674_vm11, %v1546_v61, %v1802_v7  ;;  %v1002_v50 = vmul.f32 %v3331_v29, %v837_v18  ;;  %v1127_v23 = vadd.f32 %v999_v45, %v707_v58  ;;  %v2876_v56 = vpop.f32.mrf.mxu1 }
 0x17f   : > { %v2010_v9 = vpack.c.bf16 %v1930_v25, %v1926_v53  ;;  %v1128_v55 = vadd.f32 %v1000_v2, %v708_v8  ;;  %2612 = vst [vmem:[%s4257_s10] sm:$0xff] %v2486_v20  ;;  %2410 = vmatprep.mubr.bf16.mxu0 %v2008_v31  ;;  %v1129_v0 = vadd.f32 %v1001_v11, %v709_v5  ;;  %vm1667_vm12 = vcmp.ge.f32.partialorder %v4220_v13, 0.0 }
 0x180   : > { %vm1671_vm13 = vcmp.ge.f32.partialorder %v1543_v54, 0.0  ;;  %v1795_v16 = vmul.f32 0.01, %v4220_v13  ;;  %v1130_v62 = vadd.f32 %v1002_v50, %v710_v12  ;;  %v1799_v15 = vmul.f32 0.01, %v1543_v54 }
 0x181   : > { %2571 = vmatprep.mubr.bf16.mxu1 %v2010_v9  ;;  %vm1669_vm14 = vcmp.ge.f32.partialorder %v4222_v22, 0.0  ;;  %vm1673_vm15 = vcmp.ge.f32.partialorder %v4239_v6, 0.0  ;;  %v1797_v58 = vmul.f32 0.01, %v4222_v22  ;;  %v1801_v8 = vmul.f32 0.01, %v4239_v6 }
 0x182   : > { %v1923_v61 = vsel %vm1667_vm12, %v4220_v13, %v1795_v16  ;;  %v1419_v5 = vmul.f32 %v3337_v33, %v1257_v21  ;;  %v1927_v4 = vsel %vm1671_vm13, %v1543_v54, %v1799_v15  ;;  %v1420_v18 = vmul.f32 %v3339_v34, %v1257_v21  ;;  %v1261_v47 = vpop.permute.xlu1 %1260 }
 0x183   : > { %v1421_v63 = vmul.f32 %v3341_v35, %v1257_v21  ;;  %v1422_v12 = vmul.f32 %v3343_v36, %v1257_v21  ;;  %v2007_v1 = vpack.c.bf16 %v1927_v4, %v1923_v61  ;;  %v1925_v49 = vsel %vm1669_vm14, %v4222_v22, %v1797_v58 }
 0x184   : > { %v1929_v13 = vsel %vm1673_vm15, %v4239_v6, %v1801_v8  ;;  %v4277_v51 = vadd.f32 %v1419_v5, %v1127_v23  ;;  %v1548_v32 = vadd.f32 %v1420_v18, %v1128_v55  ;;  %v2765_v2 = vadd.f32 %v2764_v30, %v2763_v57 }
 0x185   : > { %v2009_v7 = vpack.c.bf16 %v1929_v13, %v1925_v49  ;;  %v4279_v45 = vadd.f32 %v1421_v63, %v1129_v0  ;;  %v4281_v54 = vadd.f32 %v1422_v12, %v1130_v62  ;;  %2411 = vmatmul.mubr.bf16.gmra.mxu0 %v2007_v1  ;;  %v2877_v11 = vadd.f32 %v2876_v56, %v2875_v60 }
 0x186   : > { %v1003_v20 = vmul.f32 %v3325_v26, %v841_v48  ;;  %v1004_v31 = vmul.f32 %v3327_v27, %v841_v48  ;;  %v1005_v22 = vmul.f32 %v3329_v28, %v841_v48  ;;  %v1006_v6 = vmul.f32 %v3331_v29, %v841_v48 }
 0x187   : > { %2572 = vmatmul.mubr.bf16.gmra.mxu1 %v2009_v7  ;;  %v1423_v53 = vmul.f32 %v3337_v33, %v1261_v47  ;;  %v1424_v25 = vmul.f32 %v3339_v34, %v1261_v47  ;;  %v2328_v21 = vadd.f32 %v2765_v2, %v4245_v41  ;;  %v2766_v9 = vpop.f32.mrf.mxu0  ;;  %v1425_v60 = vmul.f32 %v3341_v35, %v1261_v47  ;;  %v397_v0 = vpop.permute.xlu1 %396 }
 0x188   : > { %v1131_v50 = vadd.f32 %v1003_v20, %v4163_v24  ;;  %v1132_v57 = vadd.f32 %v1004_v31, %v4166_v59  ;;  %v1133_v23 = vadd.f32 %v1005_v22, %v4169_v17  ;;  %v1134_v55 = vadd.f32 %v1006_v6, %v4173_v14 }
 0x189   : > { %v1426_v48 = vmul.f32 %v3343_v36, %v1261_v47  ;;  %vm1676_vm0 = vcmp.ge.f32.partialorder %v1548_v32, 0.0  ;;  %v2489_v16 = vadd.f32 %v2877_v11, %v2328_v21  ;;  %v2878_v62 = vpop.f32.mrf.mxu1  ;;  %v2767_v15 = vpop.f32.mrf.mxu0  ;;  %v566_v24 = vmul.f32 %v3346_v37, %v397_v0 }
 0x18a   : > { %v4296_v61 = vadd.f32 %v1423_v53, %v1131_v50  ;;  %v1552_v58 = vadd.f32 %v1424_v25, %v1132_v57  ;;  %v2768_v59 = vadd.f32 %v2767_v15, %v2766_v9  ;;  %v4299_v8 = vadd.f32 %v1425_v60, %v1133_v23 }
 0x18b   : > { %v1554_v5 = vadd.f32 %v1426_v48, %v1134_v55  ;;  %v567_v17 = vmul.f32 %v3348_v38, %v397_v0  ;;  %2613 = vst [vmem:[%s4257_s10 + $0x8] sm:$0xff] %v2489_v16  ;;  %v2879_v14 = vpop.f32.mrf.mxu1  ;;  %v2769_v4 = vpop.f32.mrf.mxu0  ;;  %v568_v18 = vmul.f32 %v3350_v39, %v397_v0  ;;  %v569_v63 = vmul.f32 %v3352_v40, %v397_v0 }
 0x18c   : > { %v715_v12 = vadd.f32 %v3355_v42, %v566_v24  ;;  %vm1680_vm1 = vcmp.ge.f32.partialorder %v1552_v58, 0.0  ;;  %v2333_v30 = vadd.f32 %v2768_v59, %v4245_v41  ;;  %v2880_v56 = vadd.f32 %v2879_v14, %v2878_v62  ;;  %v845_v9 = vpop.permute.xlu1 %844  ;;  %v1265_v24 = vpop.permute.xlu0 %1264 }
 0x18d   : > { %v716_v1 = vadd.f32 %v3357_v43, %v567_v17  ;;  %v1804_v49 = vmul.f32 0.01, %v1548_v32  ;;  %v2881_v13 = vpop.f32.mrf.mxu1  ;;  %v2770_v47 = vpop.f32.mrf.mxu0  ;;  %v717_v7 = vadd.f32 %v3359_v44, %v568_v18  ;;  %v718_v2 = vadd.f32 %v3361_v46, %v569_v63 }
 0x18e   : > { %v1808_v11 = vmul.f32 0.01, %v1552_v58  ;;  %vm1678_vm2 = vcmp.ge.f32.partialorder %v4281_v54, 0.0  ;;  %v2494_v20 = vadd.f32 %v2880_v56, %v2333_v30  ;;  %v2771_v31 = vadd.f32 %v2770_v47, %v2769_v4 }
 0x18f   : > { %v1932_v22 = vsel %vm1676_vm0, %v1548_v32, %v1804_v49  ;;  %vm1682_vm3 = vcmp.ge.f32.partialorder %v1554_v5, 0.0  ;;  %v2882_v6 = vpop.f32.mrf.mxu1  ;;  %v1806_v25 = vmul.f32 0.01, %v4281_v54  ;;  %v1810_v21 = vmul.f32 0.01, %v1554_v5 }
 0x190   : > { %v1936_v53 = vsel %vm1680_vm1, %v1552_v58, %v1808_v11  ;;  %vm1675_vm4 = vcmp.ge.f32.partialorder %v4277_v51, 0.0  ;;  %2614 = vst [vmem:[%s4257_s10 + $0x10] sm:$0xff] %v2494_v20  ;;  %v2336_v50 = vadd.f32 %v2771_v31, %v4245_v41  ;;  %v2883_v57 = vadd.f32 %v2882_v6, %v2881_v13  ;;  %v849_v4 = vpop.permute.xlu1 %848 }
 0x191   : > { %v2012_v60 = vpack.c.bf16 %v1936_v53, %v1932_v22  ;;  %v1007_v23 = vmul.f32 %v3325_v26, %v845_v9  ;;  %v1934_v32 = vsel %vm1678_vm2, %v4281_v54, %v1806_v25  ;;  %v1938_v55 = vsel %vm1682_vm3, %v1554_v5, %v1810_v21 }
 0x192   : > { %v1008_v48 = vmul.f32 %v3327_v27, %v845_v9  ;;  %v1009_v0 = vmul.f32 %v3329_v28, %v845_v9  ;;  %v2497_v16 = vadd.f32 %v2883_v57, %v2336_v50  ;;  %v2014_v62 = vpack.c.bf16 %v1938_v55, %v1934_v32 }
 0x193   : > { %2418 = vmatprep.mubr.bf16.mxu0 %v2012_v60  ;;  %v1010_v15 = vmul.f32 %v3331_v29, %v845_v9  ;;  %v1135_v58 = vadd.f32 %v1007_v23, %v715_v12  ;;  %vm1679_vm5 = vcmp.ge.f32.partialorder %v4296_v61, 0.0  ;;  %v1803_v14 = vmul.f32 0.01, %v4277_v51 }
 0x194   : > { %v1136_v59 = vadd.f32 %v1008_v48, %v716_v1  ;;  %v1137_v17 = vadd.f32 %v1009_v0, %v717_v7  ;;  %2615 = vst [vmem:[%s4257_s10 + $0x18] sm:$0xff] %v2497_v16  ;;  %2579 = vmatprep.mubr.bf16.mxu1 %v2014_v62  ;;  %v1807_v5 = vmul.f32 0.01, %v4296_v61  ;;  %vm1677_vm6 = vcmp.ge.f32.partialorder %v4279_v45, 0.0 }
 0x195   : > { %v1138_v54 = vadd.f32 %v1010_v15, %v718_v2  ;;  %vm1681_vm7 = vcmp.ge.f32.partialorder %v4299_v8, 0.0  ;;  %v1931_v18 = vsel %vm1675_vm4, %v4277_v51, %v1803_v14  ;;  %v1805_v63 = vmul.f32 0.01, %v4279_v45  ;;  %v1269_v6 = vpop.permute.xlu1 %1268 }
 0x196   : > { %v1809_v12 = vmul.f32 0.01, %v4299_v8  ;;  %v1427_v30 = vmul.f32 %v3337_v33, %v1265_v24  ;;  %v1935_v56 = vsel %vm1679_vm5, %v4296_v61, %v1807_v5  ;;  %v1428_v1 = vmul.f32 %v3339_v34, %v1265_v24 }
 0x197   : > { %v1429_v49 = vmul.f32 %v3341_v35, %v1265_v24  ;;  %v1430_v13 = vmul.f32 %v3343_v36, %v1265_v24  ;;  %v2011_v47 = vpack.c.bf16 %v1935_v56, %v1931_v18  ;;  %v1933_v7 = vsel %vm1677_vm6, %v4279_v45, %v1805_v63  ;;  %v1273_v45 = vpop.permute.xlu0 %1272 }
 0x198   : > { %v1937_v2 = vsel %vm1681_vm7, %v4299_v8, %v1809_v12  ;;  %v4342_v51 = vadd.f32 %v1427_v30, %v1135_v58  ;;  %v1556_v20 = vadd.f32 %v1428_v1, %v1136_v59  ;;  %v1011_v61 = vmul.f32 %v3325_v26, %v849_v4 }
 0x199   : > { %v2013_v11 = vpack.c.bf16 %v1937_v2, %v1933_v7  ;;  %v4344_v31 = vadd.f32 %v1429_v49, %v1137_v17  ;;  %v1558_v22 = vadd.f32 %v1430_v13, %v1138_v54  ;;  %2419 = vmatmul.mubr.bf16.gmra.mxu0 %v2011_v47  ;;  %v1012_v53 = vmul.f32 %v3327_v27, %v849_v4 }
 0x19a   : > { %v1013_v25 = vmul.f32 %v3329_v28, %v849_v4  ;;  %v1014_v21 = vmul.f32 %v3331_v29, %v849_v4  ;;  %v1431_v8 = vmul.f32 %v3337_v33, %v1269_v6  ;;  %v1432_v9 = vmul.f32 %v3339_v34, %v1269_v6  ;;  %v407_v58 = vpop.permute.xlu1 %406 }
 0x19b   : > { %2580 = vmatmul.mubr.bf16.gmra.mxu1 %v2013_v11  ;;  %v1433_v50 = vmul.f32 %v3341_v35, %v1269_v6  ;;  %v1434_v57 = vmul.f32 %v3343_v36, %v1269_v6  ;;  %v1139_v60 = vadd.f32 %v1011_v61, %v4187_v3  ;;  %v1140_v23 = vadd.f32 %v1012_v53, %v4190_v19 }
 0x19c   : > { %v1141_v32 = vadd.f32 %v1013_v25, %v4193_v52  ;;  %v1142_v55 = vadd.f32 %v1014_v21, %v4198_v10  ;;  %v4359_v48 = vmul.f32 %v3337_v33, %v1273_v45  ;;  %v4362_v0 = vmul.f32 %v3339_v34, %v1273_v45 }
 0x19d   : > { %v4365_v16 = vmul.f32 %v3341_v35, %v1273_v45  ;;  %v4368_v62 = vmul.f32 %v3343_v36, %v1273_v45  ;;  %v4370_v15 = vadd.f32 %v1431_v8, %v1139_v60  ;;  %v1560_v3 = vadd.f32 %v1432_v9, %v1140_v23 }
 0x19e   : > { %v4372_v19 = vadd.f32 %v1433_v50, %v1141_v32  ;;  %v1562_v52 = vadd.f32 %v1434_v57, %v1142_v55  ;;  %v574_v24 = vmul.f32 %v3346_v37, %v407_v58  ;;  %v575_v59 = vmul.f32 %v3348_v38, %v407_v58 }
 0x19f   : > { %v2772_v10 = vpop.f32.mrf.mxu0  ;;  %v576_v17 = vmul.f32 %v3350_v39, %v407_v58  ;;  %v577_v14 = vmul.f32 %v3352_v40, %v407_v58  ;;  %vm1684_vm8 = vcmp.ge.f32.partialorder %v1556_v20, 0.0  ;;  %vm1688_vm9 = vcmp.ge.f32.partialorder %v1560_v3, 0.0 }
 0x1a0   : > { %v2884_v4 = vpop.f32.mrf.mxu1  ;;  %v1812_v54 = vmul.f32 0.01, %v1556_v20  ;;  %v1816_v5 = vmul.f32 0.01, %v1560_v3  ;;  %v723_v63 = vadd.f32 %v3355_v42, %v574_v24  ;;  %v724_v12 = vadd.f32 %v3357_v43, %v575_v59 }
 0x1a1   : > { %v2773_v18 = vpop.f32.mrf.mxu0  ;;  %v725_v30 = vadd.f32 %v3359_v44, %v576_v17  ;;  %v726_v56 = vadd.f32 %v3361_v46, %v577_v14  ;;  %vm1686_vm10 = vcmp.ge.f32.partialorder %v1558_v22, 0.0  ;;  %vm1690_vm11 = vcmp.ge.f32.partialorder %v1562_v52, 0.0  ;;  %v853_v61 = vpop.permute.xlu1 %852 }
 0x1a2   : > { %v2774_v1 = vadd.f32 %v2773_v18, %v2772_v10  ;;  %v2885_v49 = vpop.f32.mrf.mxu1  ;;  %v1940_v13 = vsel %vm1684_vm8, %v1556_v20, %v1812_v54  ;;  %v1944_v47 = vsel %vm1688_vm9, %v1560_v3, %v1816_v5  ;;  %v1814_v6 = vmul.f32 0.01, %v1558_v22 }
 0x1a3   : > { %v2886_v7 = vadd.f32 %v2885_v49, %v2884_v4  ;;  %v2775_v2 = vpop.f32.mrf.mxu0  ;;  %v2016_v11 = vpack.c.bf16 %v1944_v47, %v1940_v13  ;;  %v1818_v21 = vmul.f32 0.01, %v1562_v52  ;;  %v1015_v45 = vmul.f32 %v3325_v26, %v853_v61 }
 0x1a4   : > { %v2341_v53 = vadd.f32 %v2774_v1, %v4245_v41  ;;  %v2887_v25 = vpop.f32.mrf.mxu1  ;;  %v1016_v8 = vmul.f32 %v3327_v27, %v853_v61  ;;  %v1942_v20 = vsel %vm1686_vm10, %v1558_v22, %v1814_v6  ;;  %v1017_v50 = vmul.f32 %v3329_v28, %v853_v61  ;;  %v412_v22 = vpop.permute.xlu0 %411 }
 0x1a5   : > { %v2776_v9 = vpop.f32.mrf.mxu0  ;;  %2426 = vmatprep.mubr.bf16.mxu0 %v2016_v11  ;;  %v1018_v57 = vmul.f32 %v3331_v29, %v853_v61  ;;  %vm1683_vm12 = vcmp.ge.f32.partialorder %v4342_v51, 0.0  ;;  %v1946_v55 = vsel %vm1690_vm11, %v1562_v52, %v1818_v21  ;;  %v4389_v3 = vadd.f32 %v1015_v45, %v723_v63  ;;  %v857_v17 = vpop.permute.xlu1 %856 }
 0x1a6   : > { %v2502_v60 = vadd.f32 %v2886_v7, %v2341_v53  ;;  %v2777_v23 = vadd.f32 %v2776_v9, %v2775_v2  ;;  %v2888_v32 = vpop.f32.mrf.mxu1  ;;  %v2018_v10 = vpack.c.bf16 %v1946_v55, %v1942_v20  ;;  %v4391_v24 = vadd.f32 %v1016_v8, %v724_v12 }
 0x1a7   : > { %v2889_v58 = vadd.f32 %v2888_v32, %v2887_v25  ;;  %v4393_v59 = vadd.f32 %v1017_v50, %v725_v30  ;;  %v4397_v4 = vadd.f32 %v1018_v57, %v726_v56  ;;  %vm1687_vm13 = vcmp.ge.f32.partialorder %v4370_v15, 0.0 }
 0x1a8   : > { %2616 = vst [vmem:[%s4257_s10 + $0x20] sm:$0xff] %v2502_v60  ;;  %v2344_v14 = vadd.f32 %v2777_v23, %v4245_v41  ;;  %v1811_v52 = vmul.f32 0.01, %v4342_v51  ;;  %2587 = vmatprep.mubr.bf16.mxu1 %v2018_v10  ;;  %v1815_v54 = vmul.f32 0.01, %v4370_v15  ;;  %vm1685_vm14 = vcmp.ge.f32.partialorder %v4344_v31, 0.0  ;;  %v422_v45 = vpop.permute.xlu0 %421 }
 0x1a9   : > { %vm1689_vm15 = vcmp.ge.f32.partialorder %v4372_v19, 0.0  ;;  %v1813_v5 = vmul.f32 0.01, %v4344_v31  ;;  %v1817_v12 = vmul.f32 0.01, %v4372_v19  ;;  %v578_v30 = vmul.f32 %v3346_v37, %v412_v22 }
 0x1aa   : > { %v2505_v18 = vadd.f32 %v2889_v58, %v2344_v14  ;;  %v1939_v63 = vsel %vm1683_vm12, %v4342_v51, %v1811_v52  ;;  %v1943_v56 = vsel %vm1687_vm13, %v4370_v15, %v1815_v54  ;;  %v579_v49 = vmul.f32 %v3348_v38, %v412_v22  ;;  %v1277_v11 = vpop.permute.xlu1 %1276 }
 0x1ab   : > { %v1941_v1 = vsel %vm1685_vm14, %v4344_v31, %v1813_v5  ;;  %v580_v13 = vmul.f32 %v3350_v39, %v412_v22  ;;  %v2015_v47 = vpack.c.bf16 %v1943_v56, %v1939_v63  ;;  %v1945_v7 = vsel %vm1689_vm15, %v4372_v19, %v1817_v12 }
 0x1ac   : > { %2617 = vst [vmem:[%s4257_s10 + $0x28] sm:$0xff] %v2505_v18  ;;  %v581_v2 = vmul.f32 %v3352_v40, %v412_v22  ;;  %v727_v51 = vadd.f32 %v3355_v42, %v578_v30  ;;  %v2017_v6 = vpack.c.bf16 %v1945_v7, %v1941_v1  ;;  %v728_v61 = vadd.f32 %v3357_v43, %v579_v49 }
 0x1ad   : > { %v729_v15 = vadd.f32 %v3359_v44, %v580_v13  ;;  %v1019_v31 = vmul.f32 %v3325_v26, %v857_v17  ;;  %2427 = vmatmul.mubr.bf16.gmra.mxu0 %v2015_v47  ;;  %v1020_v25 = vmul.f32 %v3327_v27, %v857_v17  ;;  %v1021_v21 = vmul.f32 %v3329_v28, %v857_v17 }
 0x1ae   : > { %v730_v53 = vadd.f32 %v3361_v46, %v581_v2  ;;  %v1022_v19 = vmul.f32 %v3331_v29, %v857_v17  ;;  %2588 = vmatmul.mubr.bf16.gmra.mxu1 %v2017_v6  ;;  %v1439_v9 = vmul.f32 %v3337_v33, %v1277_v11  ;;  %v1440_v20 = vmul.f32 %v3339_v34, %v1277_v11 }
 0x1af   : > { %v1147_v8 = vadd.f32 %v1019_v31, %v727_v51  ;;  %v1441_v50 = vmul.f32 %v3341_v35, %v1277_v11  ;;  %v1148_v57 = vadd.f32 %v1020_v25, %v728_v61  ;;  %v1149_v60 = vadd.f32 %v1021_v21, %v729_v15  ;;  %v417_v10 = vpop.permute.xlu1 %416 }
 0x1b0   : > { %v1150_v23 = vadd.f32 %v1022_v19, %v730_v53  ;;  %v1442_v32 = vmul.f32 %v3343_v36, %v1277_v11  ;;  %v2778_v55 = vpop.f32.mrf.mxu0  ;;  %v586_v22 = vmul.f32 %v3346_v37, %v422_v45  ;;  %v587_v17 = vmul.f32 %v3348_v38, %v422_v45 }
 0x1b1   : > { %v4429_v58 = vadd.f32 %v1439_v9, %v1147_v8  ;;  %v588_v14 = vmul.f32 %v3350_v39, %v422_v45  ;;  %v1568_v54 = vadd.f32 %v1440_v20, %v1148_v57  ;;  %v4434_v5 = vadd.f32 %v1441_v50, %v1149_v60 }
 0x1b2   : > { %v2890_v52 = vpop.f32.mrf.mxu1  ;;  %v1570_v18 = vadd.f32 %v1442_v32, %v1150_v23  ;;  %v582_v63 = vmul.f32 %v3346_v37, %v417_v10  ;;  %v2779_v12 = vpop.f32.mrf.mxu0  ;;  %v583_v30 = vmul.f32 %v3348_v38, %v417_v10  ;;  %v584_v56 = vmul.f32 %v3350_v39, %v417_v10 }
 0x1b3   : > { %v585_v1 = vmul.f32 %v3352_v40, %v417_v10  ;;  %v589_v49 = vmul.f32 %v3352_v40, %v422_v45  ;;  %v2780_v13 = vadd.f32 %v2779_v12, %v2778_v55  ;;  %v4443_v2 = vadd.f32 %v3355_v42, %v586_v22  ;;  %v1281_v12 = vpop.permute.xlu0 %1280 }
 0x1b4   : > { %v2891_v47 = vpop.f32.mrf.mxu1  ;;  %v731_v7 = vadd.f32 %v3355_v42, %v582_v63  ;;  %v4446_v51 = vadd.f32 %v3357_v43, %v587_v17  ;;  %v2781_v11 = vpop.f32.mrf.mxu0  ;;  %v732_v38 = vadd.f32 %v3357_v43, %v583_v30  ;;  %v733_v39 = vadd.f32 %v3359_v44, %v584_v56 }
 0x1b5   : > { %v2892_v37 = vadd.f32 %v2891_v47, %v2890_v52  ;;  %v734_v6 = vadd.f32 %v3361_v46, %v585_v1  ;;  %v2349_v40 = vadd.f32 %v2780_v13, %v4245_v41  ;;  %v4453_v15 = vadd.f32 %v3359_v44, %v588_v14  ;;  %v861_v21 = vpop.permute.xlu1 %860 }
 0x1b6   : > { %v2893_v61 = vpop.f32.mrf.mxu1  ;;  %v4456_v42 = vadd.f32 %v3361_v46, %v589_v49  ;;  %v1564_v31 = vadd.f32 %v4362_v0, %v4391_v24  ;;  %v2782_v53 = vpop.f32.mrf.mxu0  ;;  %vm1696_vm0 = vcmp.ge.f32.partialorder %v1568_v54, 0.0  ;;  %v1824_v43 = vmul.f32 0.01, %v1568_v54 }
 0x1b7   : > { %v1566_v25 = vadd.f32 %v4368_v62, %v4397_v4  ;;  %vm1698_vm1 = vcmp.ge.f32.partialorder %v1570_v18, 0.0  ;;  %v2510_v19 = vadd.f32 %v2892_v37, %v2349_v40  ;;  %v2783_v45 = vadd.f32 %v2782_v53, %v2781_v11 }
 0x1b8   : > { %v2894_v8 = vpop.f32.mrf.mxu1  ;;  %vm1692_vm2 = vcmp.ge.f32.partialorder %v1564_v31, 0.0  ;;  %v1820_v44 = vmul.f32 0.01, %v1564_v31  ;;  %v1952_v46 = vsel %vm1696_vm0, %v1568_v54, %v1824_v43  ;;  %v1826_v50 = vmul.f32 0.01, %v1570_v18 }
 0x1b9   : > { %v2895_v9 = vadd.f32 %v2894_v8, %v2893_v61  ;;  %vm1694_vm3 = vcmp.ge.f32.partialorder %v1566_v25, 0.0  ;;  %v1822_v20 = vmul.f32 0.01, %v1566_v25  ;;  %2618 = vst [vmem:[%s4257_s10 + $0x30] sm:$0xff] %v2510_v19  ;;  %v2352_v0 = vadd.f32 %v2783_v45, %v4245_v41  ;;  %v865_v54 = vpop.permute.xlu1 %864 }
 0x1ba   : > { %v1948_v24 = vsel %vm1692_vm2, %v1564_v31, %v1820_v44  ;;  %v1023_v57 = vmul.f32 %v3325_v26, %v861_v21  ;;  %v1024_v60 = vmul.f32 %v3327_v27, %v861_v21  ;;  %v1025_v23 = vmul.f32 %v3329_v28, %v861_v21 }
 0x1bb   : > { %v2020_v62 = vpack.c.bf16 %v1952_v46, %v1948_v24  ;;  %v1950_v4 = vsel %vm1694_vm3, %v1566_v25, %v1822_v20  ;;  %v2513_v32 = vadd.f32 %v2895_v9, %v2352_v0  ;;  %v1954_v55 = vsel %vm1698_vm1, %v1570_v18, %v1826_v50 }
 0x1bc   : > { %v1026_v10 = vmul.f32 %v3331_v29, %v861_v21  ;;  %v1563_v22 = vadd.f32 %v4359_v48, %v4389_v3  ;;  %v2022_v17 = vpack.c.bf16 %v1954_v55, %v1950_v4  ;;  %vm1695_vm4 = vcmp.ge.f32.partialorder %v4429_v58, 0.0 }
 0x1bd   : > { %2434 = vmatprep.mubr.bf16.mxu0 %v2020_v62  ;;  %v1823_v14 = vmul.f32 0.01, %v4429_v58  ;;  %v1565_v52 = vadd.f32 %v4365_v16, %v4393_v59  ;;  %2619 = vst [vmem:[%s4257_s10 + $0x38] sm:$0xff] %v2513_v32  ;;  %vm1697_vm6 = vcmp.ge.f32.partialorder %v4434_v5, 0.0  ;;  %v1825_v18 = vmul.f32 0.01, %v4434_v5 }
 0x1be   : > { %vm1691_vm5 = vcmp.ge.f32.partialorder %v1563_v22, 0.0  ;;  %v1819_v63 = vmul.f32 0.01, %v1563_v22  ;;  %2595 = vmatprep.mubr.bf16.mxu1 %v2022_v17  ;;  %v1151_v30 = vadd.f32 %v1023_v57, %v731_v7  ;;  %v1152_v49 = vadd.f32 %v1024_v60, %v732_v38 }
 0x1bf   : > { %v1951_v48 = vsel %vm1695_vm4, %v4429_v58, %v1823_v14  ;;  %vm1693_vm7 = vcmp.ge.f32.partialorder %v1565_v52, 0.0  ;;  %v1821_v3 = vmul.f32 0.01, %v1565_v52  ;;  %v1953_v1 = vsel %vm1697_vm6, %v4434_v5, %v1825_v18 }
 0x1c0   : > { %v1947_v56 = vsel %vm1691_vm5, %v1563_v22, %v1819_v63  ;;  %v1153_v16 = vadd.f32 %v1025_v23, %v733_v39  ;;  %v1154_v47 = vadd.f32 %v1026_v10, %v734_v6  ;;  %v1443_v37 = vmul.f32 %v3337_v33, %v1281_v12  ;;  %v1285_v6 = vpop.permute.xlu1 %1284 }
 0x1c1   : > { %v2019_v59 = vpack.c.bf16 %v1951_v48, %v1947_v56  ;;  %v1949_v13 = vsel %vm1693_vm7, %v1565_v52, %v1821_v3  ;;  %v1444_v40 = vmul.f32 %v3339_v34, %v1281_v12  ;;  %v1445_v61 = vmul.f32 %v3341_v35, %v1281_v12  ;;  %v2784_v31 = vpop.f32.mrf.mxu0 }
 0x1c2   : > { %v2021_v11 = vpack.c.bf16 %v1953_v1, %v1949_v13  ;;  %v1446_v58 = vmul.f32 %v3343_v36, %v1281_v12  ;;  %v4484_v7 = vadd.f32 %v1443_v37, %v1151_v30  ;;  %v1027_v5 = vmul.f32 %v3325_v26, %v865_v54 }
 0x1c3   : > { %2435 = vmatmul.mubr.bf16.gmra.mxu0 %v2019_v59  ;;  %v2896_v53 = vpop.f32.mrf.mxu1  ;;  %v1028_v38 = vmul.f32 %v3327_v27, %v865_v54  ;;  %v1029_v39 = vmul.f32 %v3329_v28, %v865_v54  ;;  %v1572_v43 = vadd.f32 %v1444_v40, %v1152_v49  ;;  %v1573_v25 = vadd.f32 %v1445_v61, %v1153_v16  ;;  %v2785_v45 = vpop.f32.mrf.mxu0 }
 0x1c4   : > { %2596 = vmatmul.mubr.bf16.gmra.mxu1 %v2021_v11  ;;  %v1574_v21 = vadd.f32 %v1446_v58, %v1154_v47  ;;  %v1030_v19 = vmul.f32 %v3331_v29, %v865_v54  ;;  %v2786_v8 = vadd.f32 %v2785_v45, %v2784_v31  ;;  %v1155_v9 = vadd.f32 %v1027_v5, %v4443_v2 }
 0x1c5   : > { %v2897_v44 = vpop.f32.mrf.mxu1  ;;  %v1156_v46 = vadd.f32 %v1028_v38, %v4446_v51  ;;  %v1157_v26 = vadd.f32 %v1029_v39, %v4453_v15  ;;  %v2787_v27 = vpop.f32.mrf.mxu0  ;;  %v1447_v0 = vmul.f32 %v3337_v33, %v1285_v6  ;;  %v1448_v24 = vmul.f32 %v3339_v34, %v1285_v6 }
 0x1c6   : > { %v2898_v20 = vadd.f32 %v2897_v44, %v2896_v53  ;;  %v1158_v28 = vadd.f32 %v1030_v19, %v4456_v42  ;;  %v2357_v50 = vadd.f32 %v2786_v8, %v4245_v41  ;;  %v1449_v57 = vmul.f32 %v3341_v35, %v1285_v6 }
 0x1c7   : > { %v2899_v29 = vpop.f32.mrf.mxu1  ;;  %v1450_v62 = vmul.f32 %v3343_v36, %v1285_v6  ;;  %vm1700_vm8 = vcmp.ge.f32.partialorder %v1572_v43, 0.0  ;;  %v2788_v2 = vpop.f32.mrf.mxu0  ;;  %v1575_v51 = vadd.f32 %v1447_v0, %v1155_v9  ;;  %v1576_v15 = vadd.f32 %v1448_v24, %v1156_v46 }
 0x1c8   : > { %v1828_v4 = vmul.f32 0.01, %v1572_v43  ;;  %vm1702_vm9 = vcmp.ge.f32.partialorder %v1574_v21, 0.0  ;;  %v2518_v60 = vadd.f32 %v2898_v20, %v2357_v50  ;;  %v2789_v42 = vadd.f32 %v2788_v2, %v2787_v27 }
 0x1c9   : > { %v2900_v23 = vpop.f32.mrf.mxu1  ;;  %v1577_v33 = vadd.f32 %v1449_v57, %v1157_v26  ;;  %v1578_v32 = vadd.f32 %v1450_v62, %v1158_v28  ;;  %vm1704_vm10 = vcmp.ge.f32.partialorder %v1576_v15, 0.0  ;;  %v1832_v55 = vmul.f32 0.01, %v1576_v15 }
 0x1ca   : > { %v2901_v34 = vadd.f32 %v2900_v23, %v2899_v29  ;;  %v1956_v10 = vsel %vm1700_vm8, %v1572_v43, %v1828_v4  ;;  %2620 = vst [vmem:[%s4257_s10 + $0x40] sm:$0xff] %v2518_v60  ;;  %v2360_v35 = vadd.f32 %v2789_v42, %v4245_v41  ;;  %v1830_v36 = vmul.f32 0.01, %v1574_v21 }
 0x1cb   : > { %vm1706_vm11 = vcmp.ge.f32.partialorder %v1578_v32, 0.0  ;;  %v1834_v22 = vmul.f32 0.01, %v1578_v32  ;;  %v1960_v17 = vsel %vm1704_vm10, %v1576_v15, %v1832_v55  ;;  %vm1699_vm12 = vcmp.ge.f32.partialorder %v4484_v7, 0.0 }
 0x1cc   : > { %vm1703_vm13 = vcmp.ge.f32.partialorder %v1575_v51, 0.0  ;;  %v1827_v14 = vmul.f32 0.01, %v4484_v7  ;;  %v2521_v52 = vadd.f32 %v2901_v34, %v2360_v35  ;;  %v2024_v54 = vpack.c.bf16 %v1960_v17, %v1956_v10 }
 0x1cd   : > { %v1958_v63 = vsel %vm1702_vm9, %v1574_v21, %v1830_v36  ;;  %v1962_v18 = vsel %vm1706_vm11, %v1578_v32, %v1834_v22  ;;  %v1831_v48 = vmul.f32 0.01, %v1575_v51  ;;  %vm1701_vm14 = vcmp.ge.f32.partialorder %v1573_v25, 0.0 }
 0x1ce   : > { %v2026_v12 = vpack.c.bf16 %v1962_v18, %v1958_v63  ;;  %2621 = vst [vmem:[%s4257_s10 + $0x48] sm:$0xff] %v2521_v52  ;;  %2442 = vmatprep.mubr.bf16.mxu0 %v2024_v54  ;;  %vm1705_vm15 = vcmp.ge.f32.partialorder %v1577_v33, 0.0  ;;  %v1829_v3 = vmul.f32 0.01, %v1573_v25  ;;  %v1833_v30 = vmul.f32 0.01, %v1577_v33 }
 0x1cf   : > { %v1955_v56 = vsel %vm1699_vm12, %v4484_v7, %v1827_v14  ;;  %v1959_v1 = vsel %vm1703_vm13, %v1575_v51, %v1831_v48 }
 0x1d0   : > { %2603 = vmatprep.mubr.bf16.mxu1 %v2026_v12  ;;  %v2023_v49 = vpack.c.bf16 %v1959_v1, %v1955_v56  ;;  %v1957_v16 = vsel %vm1701_vm14, %v1573_v25, %v1829_v3  ;;  %v1961_v59 = vsel %vm1705_vm15, %v1577_v33, %v1833_v30 }
 0x1d1   : > { %v2025_v13 = vpack.c.bf16 %v1961_v59, %v1957_v16  ;;  %v4526_v59 = vld [vmem:[%s4565_s4] ss:$0 sm:$0xff] }
 0x1d2   : > { %2443 = vmatmul.mubr.bf16.gmra.mxu0 %v2023_v49  ;;  %v2790_v47 = vpop.f32.mrf.mxu0 }
 0x1d3   : > { %2604 = vmatmul.mubr.bf16.gmra.mxu1 %v2025_v13 }
 0x1d4   : > { %v2902_v37 = vpop.f32.mrf.mxu1  ;;  %v2791_v11 = vpop.f32.mrf.mxu0 }
 0x1d5   : > { %v2792_v40 = vadd.f32 %v2791_v11, %v2790_v47 }
 0x1d6   : > { %v2903_v61 = vpop.f32.mrf.mxu1  ;;  %v2793_v58 = vpop.f32.mrf.mxu0 }
 0x1d7   : > { %v2365_v31 = vadd.f32 %v2792_v40, %v4245_v41  ;;  %v2904_v53 = vadd.f32 %v2903_v61, %v2902_v37 }
 0x1d8   : > { %v2905_v7 = vpop.f32.mrf.mxu1  ;;  %v2794_v5 = vpop.f32.mrf.mxu0 }
 0x1d9   : > { %v2526_v38 = vadd.f32 %v2904_v53, %v2365_v31  ;;  %v2795_v39 = vadd.f32 %v2794_v5, %v2793_v58 }
 0x1da   : > { %v2906_v6 = vpop.f32.mrf.mxu1 }
 0x1db   : > { %2622 = vst [vmem:[%s4257_s10 + $0x50] sm:$0xff] %v2526_v38  ;;  %v2368_v43 = vadd.f32 %v2795_v39, %v4245_v41  ;;  %v2907_v25 = vadd.f32 %v2906_v6, %v2905_v7 }
 0x1dd   : > { %v2529_v21 = vadd.f32 %v2907_v25, %v2368_v43 }
 0x1df   : > { %2623 = vst [vmem:[%s4257_s10 + $0x58] sm:$0xff] %v2529_v21 }
 0x1e3   : > { %v2796_v19 = vpop.f32.mrf.mxu0 }
 0x1e5   : > { %v2908_v45 = vpop.f32.mrf.mxu1  ;;  %v2797_v8 = vpop.f32.mrf.mxu0 }
 0x1e6   : > { %v2798_v44 = vadd.f32 %v2797_v8, %v2796_v19 }
 0x1e7   : > { %v2909_v9 = vpop.f32.mrf.mxu1  ;;  %v2799_v46 = vpop.f32.mrf.mxu0 }
 0x1e8   : > { %v2373_v26 = vadd.f32 %v2798_v44, %v4245_v41  ;;  %v2910_v20 = vadd.f32 %v2909_v9, %v2908_v45 }
 0x1e9   : > { %v2911_v27 = vpop.f32.mrf.mxu1  ;;  %v2800_v28 = vpop.f32.mrf.mxu0 }
 0x1ea   : > { %v2534_v0 = vadd.f32 %v2910_v20, %v2373_v26  ;;  %v2801_v24 = vadd.f32 %v2800_v28, %v2799_v46 }
 0x1eb   : > { %v2912_v50 = vpop.f32.mrf.mxu1 }
 0x1ec   : > { %2624 = vst [vmem:[%s4257_s10 + $0x60] sm:$0xff] %v2534_v0  ;;  %v2376_v29 = vadd.f32 %v2801_v24, %v4245_v41  ;;  %v2913_v57 = vadd.f32 %v2912_v50, %v2911_v27 }
 0x1ee   : > { %v2537_v62 = vadd.f32 %v2913_v57, %v2376_v29 }
 0x1f0   : > { %2625 = vst [vmem:[%s4257_s10 + $0x68] sm:$0xff] %v2537_v62 }
 0x1f7   : > { %v2802_v2 = vpop.f32.mrf.mxu0 }
 0x1f9   : > { %v2914_v51 = vpop.f32.mrf.mxu1  ;;  %v2803_v15 = vpop.f32.mrf.mxu0 }
 0x1fa   : > { %v2804_v4 = vadd.f32 %v2803_v15, %v2802_v2 }
 0x1fb   : > { %v2915_v60 = vpop.f32.mrf.mxu1  ;;  %v2805_v42 = vpop.f32.mrf.mxu0 }
 0x1fc   : > { %v2381_v23 = vadd.f32 %v2804_v4, %v4245_v41  ;;  %v2916_v33 = vadd.f32 %v2915_v60, %v2914_v51 }
 0x1fd   : > { %v2917_v32 = vpop.f32.mrf.mxu1  ;;  %v2806_v34 = vpop.f32.mrf.mxu0 }
 0x1fe   : > { %v2542_v55 = vadd.f32 %v2916_v33, %v2381_v23  ;;  %v2807_v10 = vadd.f32 %v2806_v34, %v2805_v42 }
 0x1ff   : > { %v2918_v35 = vpop.f32.mrf.mxu1 }
 0x200   : > { %2626 = vst [vmem:[%s4257_s10 + $0x70] sm:$0xff] %v2542_v55  ;;  %v2384_v36 = vadd.f32 %v2807_v10, %v4245_v41  ;;  %v2919_v22 = vadd.f32 %v2918_v35, %v2917_v32 }
 0x202   : > { %v2545_v17 = vadd.f32 %v2919_v22, %v2384_v36 }
 0x204   : > { %2627 = vst [vmem:[%s4257_s10 + $0x78] sm:$0xff] %v2545_v17 }
 0x209   : > { %v2808_v14 = vpop.f32.mrf.mxu0 }
 0x20b   : > { %v2809_v54 = vpop.f32.mrf.mxu0 }
 0x20c   : > { %v2920_v52 = vpop.f32.mrf.mxu1  ;;  %v2810_v63 = vadd.f32 %v2809_v54, %v2808_v14 }
 0x20d   : > { %v2811_v12 = vpop.f32.mrf.mxu0 }
 0x20e   : > { %v2921_v18 = vpop.f32.mrf.mxu1  ;;  %v2389_v48 = vadd.f32 %v2810_v63, %v4245_v41 }
 0x20f   : > { %v2922_v3 = vadd.f32 %v2921_v18, %v2920_v52  ;;  %v2812_v56 = vpop.f32.mrf.mxu0 }
 0x210   : > { %v2923_v30 = vpop.f32.mrf.mxu1  ;;  %v2813_v49 = vadd.f32 %v2812_v56, %v2811_v12 }
 0x211   : > { %v2550_v1 = vadd.f32 %v2922_v3, %v2389_v48 }
 0x212   : > { %v2924_v16 = vpop.f32.mrf.mxu1  ;;  %v2392_v13 = vadd.f32 %v4526_v59, %v2813_v49 }
 0x213   : > { %2628 = vst [vmem:[%s4257_s10 + $0x80] sm:$0xff] %v2550_v1  ;;  %v2925_v47 = vadd.f32 %v2924_v16, %v2923_v30 }
 0x215   : > { %v2553_v37 = vadd.f32 %v2925_v47, %v2392_v13 }
 0x217   : > { %2629 = vst [vmem:[%s4257_s10 + $0x88] sm:$0xff] %v2553_v37 }
 0x21b   : > { %v2814_v11 = vpop.f32.mrf.mxu0 }
 0x21d   : > { %v2926_v41 = vpop.f32.mrf.mxu1  ;;  %v2815_v40 = vpop.f32.mrf.mxu0 }
 0x21e   : > { %v2816_v61 = vadd.f32 %v2815_v40, %v2814_v11 }
 0x21f   : > { %v2927_v58 = vpop.f32.mrf.mxu1  ;;  %v2817_v31 = vpop.f32.mrf.mxu0 }
 0x220   : > { %v2397_v53 = vadd.f32 %v4526_v59, %v2816_v61  ;;  %v2928_v7 = vadd.f32 %v2927_v58, %v2926_v41 }
 0x221   : > { %v2929_v5 = vpop.f32.mrf.mxu1  ;;  %v2818_v38 = vpop.f32.mrf.mxu0 }
 0x222   : > { %v2558_v39 = vadd.f32 %v2928_v7, %v2397_v53  ;;  %v2819_v6 = vadd.f32 %v2818_v38, %v2817_v31 }
 0x223   : > { %v2930_v43 = vpop.f32.mrf.mxu1 }
 0x224   : > { %2630 = vst [vmem:[%s4257_s10 + $0x90] sm:$0xff] %v2558_v39  ;;  %v2400_v25 = vadd.f32 %v4526_v59, %v2819_v6  ;;  %v2931_v21 = vadd.f32 %v2930_v43, %v2929_v5 }
 0x226   : > { %v2561_v19 = vadd.f32 %v2931_v21, %v2400_v25 }
 0x228   : > { %2631 = vst [vmem:[%s4257_s10 + $0x98] sm:$0xff] %v2561_v19 }
 0x233   : > { %v2820_v45 = vpop.f32.mrf.mxu0 }
 0x235   : > { %v2932_v8 = vpop.f32.mrf.mxu1  ;;  %v2821_v44 = vpop.f32.mrf.mxu0 }
 0x236   : > { %v2822_v9 = vadd.f32 %v2821_v44, %v2820_v45 }
 0x237   : > { %v2933_v46 = vpop.f32.mrf.mxu1  ;;  %v2823_v26 = vpop.f32.mrf.mxu0 }
 0x238   : > { %v2405_v20 = vadd.f32 %v4526_v59, %v2822_v9  ;;  %v2934_v27 = vadd.f32 %v2933_v46, %v2932_v8 }
 0x239   : > { %v2935_v28 = vpop.f32.mrf.mxu1  ;;  %v2824_v0 = vpop.f32.mrf.mxu0 }
 0x23a   : > { %v2566_v24 = vadd.f32 %v2934_v27, %v2405_v20  ;;  %v2825_v50 = vadd.f32 %v2824_v0, %v2823_v26 }
 0x23b   : > { %v2936_v29 = vpop.f32.mrf.mxu1 }
 0x23c   : > { %2632 = vst [vmem:[%s4257_s10 + $0xa0] sm:$0xff] %v2566_v24  ;;  %v2408_v57 = vadd.f32 %v4526_v59, %v2825_v50  ;;  %v2937_v62 = vadd.f32 %v2936_v29, %v2935_v28 }
 0x23e   : > { %v2569_v2 = vadd.f32 %v2937_v62, %v2408_v57 }
 0x240   : > { %2633 = vst [vmem:[%s4257_s10 + $0xa8] sm:$0xff] %v2569_v2 }
 0x245   : > { %v2826_v51 = vpop.f32.mrf.mxu0 }
 0x247   : > { %v2938_v15 = vpop.f32.mrf.mxu1  ;;  %v2827_v4 = vpop.f32.mrf.mxu0 }
 0x248   : > { %v2828_v60 = vadd.f32 %v2827_v4, %v2826_v51 }
 0x249   : > { %v2939_v42 = vpop.f32.mrf.mxu1  ;;  %v2829_v23 = vpop.f32.mrf.mxu0 }
 0x24a   : > { %v2413_v33 = vadd.f32 %v4526_v59, %v2828_v60  ;;  %v2940_v32 = vadd.f32 %v2939_v42, %v2938_v15 }
 0x24b   : > { %v2941_v34 = vpop.f32.mrf.mxu1  ;;  %v2830_v55 = vpop.f32.mrf.mxu0 }
 0x24c   : > { %v2574_v10 = vadd.f32 %v2940_v32, %v2413_v33  ;;  %v2831_v35 = vadd.f32 %v2830_v55, %v2829_v23 }
 0x24d   : > { %v2942_v36 = vpop.f32.mrf.mxu1 }
 0x24e   : > { %2634 = vst [vmem:[%s4257_s10 + $0xb0] sm:$0xff] %v2574_v10  ;;  %v2416_v22 = vadd.f32 %v4526_v59, %v2831_v35  ;;  %v2943_v17 = vadd.f32 %v2942_v36, %v2941_v34 }
 0x250   : > { %v2577_v14 = vadd.f32 %v2943_v17, %v2416_v22 }
 0x252   : > { %2635 = vst [vmem:[%s4257_s10 + $0xb8] sm:$0xff] %v2577_v14 }
 0x259   : > { %v2832_v52 = vpop.f32.mrf.mxu0 }
 0x25b   : > { %v2944_v54 = vpop.f32.mrf.mxu1  ;;  %v2833_v63 = vpop.f32.mrf.mxu0 }
 0x25c   : > { %v2834_v18 = vadd.f32 %v2833_v63, %v2832_v52 }
 0x25d   : > { %v2945_v12 = vpop.f32.mrf.mxu1  ;;  %v2835_v48 = vpop.f32.mrf.mxu0 }
 0x25e   : > { %v2421_v3 = vadd.f32 %v4526_v59, %v2834_v18  ;;  %v2946_v30 = vadd.f32 %v2945_v12, %v2944_v54 }
 0x25f   : > { %v2947_v56 = vpop.f32.mrf.mxu1  ;;  %v2836_v1 = vpop.f32.mrf.mxu0 }
 0x260   : > { %v2582_v49 = vadd.f32 %v2946_v30, %v2421_v3  ;;  %v2837_v16 = vadd.f32 %v2836_v1, %v2835_v48 }
 0x261   : > { %v2948_v13 = vpop.f32.mrf.mxu1 }
 0x262   : > { %2636 = vst [vmem:[%s4257_s10 + $0xc0] sm:$0xff] %v2582_v49  ;;  %v2424_v47 = vadd.f32 %v4526_v59, %v2837_v16  ;;  %v2949_v37 = vadd.f32 %v2948_v13, %v2947_v56 }
 0x264   : > { %v2585_v11 = vadd.f32 %v2949_v37, %v2424_v47 }
 0x266   : > { %2637 = vst [vmem:[%s4257_s10 + $0xc8] sm:$0xff] %v2585_v11 }
 0x26d   : > { %v2838_v41 = vpop.f32.mrf.mxu0 }
 0x26e   : > { %v2950_v40 = vpop.f32.mrf.mxu1 }
 0x26f   : > { %v2839_v61 = vpop.f32.mrf.mxu0 }
 0x270   : > { %v2840_v58 = vadd.f32 %v2839_v61, %v2838_v41  ;;  %v2951_v31 = vpop.f32.mrf.mxu1 }
 0x271   : > { %v2841_v53 = vpop.f32.mrf.mxu0  ;;  %v2952_v5 = vadd.f32 %v2951_v31, %v2950_v40 }
 0x272   : > { %v2429_v7 = vadd.f32 %v4526_v59, %v2840_v58  ;;  %v2953_v38 = vpop.f32.mrf.mxu1 }
 0x273   : > { %v2842_v39 = vpop.f32.mrf.mxu0 }
 0x274   : > { %v2590_v6 = vadd.f32 %v2952_v5, %v2429_v7  ;;  %v2843_v43 = vadd.f32 %v2842_v39, %v2841_v53  ;;  %v2954_v25 = vpop.f32.mrf.mxu1 }
 0x275   : > { %v2955_v19 = vadd.f32 %v2954_v25, %v2953_v38 }
 0x276   : > { %2638 = vst [vmem:[%s4257_s10 + $0xd0] sm:$0xff] %v2590_v6  ;;  %v2432_v21 = vadd.f32 %v4526_v59, %v2843_v43 }
 0x278   : > { %v2593_v45 = vadd.f32 %v2955_v19, %v2432_v21 }
 0x27a   : > { %2639 = vst [vmem:[%s4257_s10 + $0xd8] sm:$0xff] %v2593_v45 }
 0x283   : > { %v2844_v8 = vpop.f32.mrf.mxu0 }
 0x284   : > { %v2956_v44 = vpop.f32.mrf.mxu1 }
 0x285   : > { %v2845_v9 = vpop.f32.mrf.mxu0 }
 0x286   : > { %v2846_v46 = vadd.f32 %v2845_v9, %v2844_v8  ;;  %v2957_v26 = vpop.f32.mrf.mxu1 }
 0x287   : > { %v2847_v20 = vpop.f32.mrf.mxu0  ;;  %v2958_v28 = vadd.f32 %v2957_v26, %v2956_v44 }
 0x288   : > { %v2437_v27 = vadd.f32 %v4526_v59, %v2846_v46  ;;  %v2959_v0 = vpop.f32.mrf.mxu1 }
 0x289   : > { %v2848_v24 = vpop.f32.mrf.mxu0 }
 0x28a   : > { %v2598_v50 = vadd.f32 %v2958_v28, %v2437_v27  ;;  %v2849_v29 = vadd.f32 %v2848_v24, %v2847_v20  ;;  %v2960_v57 = vpop.f32.mrf.mxu1 }
 0x28b   : > { %v2961_v2 = vadd.f32 %v2960_v57, %v2959_v0 }
 0x28c   : > { %2640 = vst [vmem:[%s4257_s10 + $0xe0] sm:$0xff] %v2598_v50  ;;  %v2440_v62 = vadd.f32 %v4526_v59, %v2849_v29 }
 0x28e   : > { %v2601_v51 = vadd.f32 %v2961_v2, %v2440_v62 }
 0x290   : > { %2641 = vst [vmem:[%s4257_s10 + $0xe8] sm:$0xff] %v2601_v51 }
 0x292   : > { %v2850_v15 = vpop.f32.mrf.mxu0 }
 0x293   : > { %v2962_v4 = vpop.f32.mrf.mxu1 }
 0x294   : > { %v2851_v60 = vpop.f32.mrf.mxu0 }
 0x295   : > { %v2852_v42 = vadd.f32 %v2851_v60, %v2850_v15  ;;  %v2963_v23 = vpop.f32.mrf.mxu1 }
 0x296   : > { %v2853_v33 = vpop.f32.mrf.mxu0  ;;  %v2964_v34 = vadd.f32 %v2963_v23, %v2962_v4 }
 0x297   : > { %v2445_v32 = vadd.f32 %v4526_v59, %v2852_v42  ;;  %v2965_v55 = vpop.f32.mrf.mxu1 }
 0x298   : > { %v2854_v10 = vpop.f32.mrf.mxu0 }
 0x299   : > { %v2606_v35 = vadd.f32 %v2964_v34, %v2445_v32  ;;  %v2855_v36 = vadd.f32 %v2854_v10, %v2853_v33  ;;  %v2966_v22 = vpop.f32.mrf.mxu1 }
 0x29a   : > { %v2967_v14 = vadd.f32 %v2966_v22, %v2965_v55 }
 0x29b   : > { %2642 = vst [vmem:[%s4257_s10 + $0xf0] sm:$0xff] %v2606_v35  ;;  %v2448_v17 = vadd.f32 %v4526_v59, %v2855_v36 }
 0x29d   : > { %v2609_v52 = vadd.f32 %v2967_v14, %v2448_v17 }
 0x29f   : > { %2643 = vst [vmem:[%s4257_s10 + $0xf8] sm:$0xff] %v2609_v52 }
 0x2a0 PF: > { %s15_s18 = sadd.s32 1, %s3081_s18  }
 0x2a1   : > { %p12_p4 = scmp.ge.s32.totalorder %s15_s18, 4  }
 0x2a3   :  { %14 = sbr.rel (!%p12_p4) target bundleno = 1 (0x1), region = 70 }

</bundles_post_ra>
